<compile_context>
chip_gen: v7x
topology: tpu7x:2x2x1
jax: 0.10.0
libtpu: 0.0.40
codegen_flags: <defaults>
</compile_context>

<pallas_src>
import math

import jax
import jax.numpy as jnp
from jax import lax
from jax.experimental import pallas as pl
from jax.experimental.pallas import tpu as pltpu


# ----------------------------------------------------------------------------
# Static config derivation (mirrors JetConv.__init__ / build_conv / get_groups)
# ----------------------------------------------------------------------------
def _validate_group_conv_sizes(in_ch, out_ch):
    return [i for i in range(1, in_ch + 1) if in_ch % i == 0 and out_ch % i == 0]


def _get_groups(in_ch, out_ch):
    sizes = _validate_group_conv_sizes(in_ch, out_ch)
    mean = sum(sizes) / len(sizes)
    idx = min(range(len(sizes)), key=lambda i: abs(sizes[i] - mean))
    return sizes[idx]


def _get_dil_size(ks):
    if ks <= 3:
        return 1
    if ks == 5:
        return 2
    if ks == 7:
        return 3
    raise ValueError(f"unsupported kernel size {ks}")


def jetconv_config(input_wh, in_ch, out_ch, s=1, residual=False, jsc=None):
    """Static JetConv config.

    Returns dict with:
      stages: list of (pad_h, pad_w, kh, kw, dil_h, dil_w) depthwise ops applied
              in order (side 'l' then side 'r' for asymmetric combinations).
      in_ch, out_ch, groups, s, residual
    """
    if jsc is None:
        raise ValueError("[ERROR] The JetSeg Combination can't be NONE")
    # TODO(synk): only single-combination jsc (len(jsc) == 1) is supported; a
    # chain of several combinations would need per-op padding (no hoisting).
    if len(jsc) != 1:
        raise NotImplementedError("only len(jsc) == 1 configurations supported")
    comb = jsc[0] if isinstance(jsc[0], list) else list(jsc)

    asym = len(comb) == 2 and all(isinstance(t, tuple) for t in comb)
    std = len(comb) == 1 and isinstance(comb[0], tuple)
    if not (asym or std):
        raise ValueError("[ERROR] Not asymmetric not standard convolution ???")

    ks = max(max(t) for t in comb)
    if asym:
        dil = _get_dil_size(ks)
        pad = int((dil * (ks - 1)) / 2)
        if ks == 3:
            # get_asym_cfg ks==3 branch: padding 0; dilation 0 clamped to 1.
            stages = [(0, 0, ks, 1, 1, 1), (0, 0, 1, ks, 1, 1)]
        else:
            # side 'l': kernel (ks,1), pad (pad,0), dil (dil,1)
            # side 'r': kernel (1,ks), pad (0,pad), dil (1,dil)
            stages = [(pad, 0, ks, 1, dil, 1), (0, pad, 1, ks, 1, dil)]
    else:
        dil = 1
        pad = int((dil * (ks - 1)) / 2)
        stages = [(pad, pad, ks, ks, dil, dil)]

    new_channels = in_ch  # lvl_fts == 1 (residuals list is empty in forward)
    if in_ch == out_ch:
        groups = _get_groups(new_channels, in_ch)
    else:
        groups = _get_groups(new_channels, out_ch)

    return dict(stages=stages, in_ch=in_ch, out_ch=out_ch, groups=groups,
                s=s, residual=residual, input_wh=tuple(input_wh))


def init_jetconv_params(key, cfg):
    """Deterministic weights in the PyTorch layouts:
       depthwise: (in_ch, 1, kh, kw); pointwise: (out_ch, in_ch // g, 1, 1)."""
    in_ch, out_ch, g = cfg["in_ch"], cfg["out_ch"], cfg["groups"]
    keys = jax.random.split(key, len(cfg["stages"]) + 1)
    dw_ws = []
    for (_, _, kh, kw, _, _), k in zip(cfg["stages"], keys[:-1]):
        dw_ws.append(jax.random.normal(k, (in_ch, 1, kh, kw), jnp.float32)
                     * (1.0 / math.sqrt(kh * kw)))
    pw_w = (jax.random.normal(keys[-1], (out_ch, in_ch // g, 1, 1), jnp.float32)
            * (1.0 / math.sqrt(in_ch // g)))
    return dw_ws, pw_w


def _grouped_pointwise_dense(pw_w, in_ch, out_ch, groups):
    """(out_ch, in_ch//g, 1, 1) grouped 1x1 conv weight -> dense (in_ch, out_ch)
    block-diagonal matrix so the kernel does a single MXU matmul.
    # TODO(synk): for very large channel counts / many groups a per-group
    # batched matmul would avoid the (groups x) zero-block FLOPs."""
    in_per = in_ch // groups
    out_per = out_ch // groups
    w2 = pw_w.reshape(out_ch, in_per).astype(jnp.float32)
    ci = jnp.arange(in_ch)[:, None]
    co = jnp.arange(out_ch)[None, :]
    gi_in = ci // in_per
    gi_out = co // out_per
    local = jnp.clip(ci - gi_out * in_per, 0, in_per - 1)
    vals = w2[co, local]                      # (in_ch, out_ch)
    return jnp.where(gi_in == gi_out, vals, 0.0)


# ----------------------------------------------------------------------------
# Fused Pallas kernel
# ----------------------------------------------------------------------------
def _make_jetconv_kernel(stages, ph_tot, pw_tot, H, W, cin, cout,
                         stride, residual, out_dtype):
    n_st = len(stages)

    def kernel(*refs):
        x_ref = refs[0]                       # (Bb, H, W, cin)
        w_refs = refs[1:1 + n_st]             # each (kh*kw, cin)
        wpw_ref = refs[1 + n_st]              # (cin, cout) block-diagonal
        o_ref = refs[2 + n_st]                # (Bb, Ho, Wo, cout)
        xpad_ref = refs[3 + n_st]             # VMEM (Bb, H+2ph, W+2pw, cin)

        # Zero-padded input lives only in VMEM: x is read from HBM exactly once.
        if ph_tot or pw_tot:
            xpad_ref[...] = jnp.zeros_like(xpad_ref)
        xpad_ref[:, ph_tot:ph_tot + H, pw_tot:pw_tot + W, :] = (
            x_ref[...].astype(jnp.float32))
        cur = xpad_ref[...]

        # Depthwise stage(s): ks-tap shift + per-channel FMA. Channels are on
        # the lane axis, so each tap vector broadcasts along lanes for free.
        for (_, _, kh, kw, dh, dw), w_ref in zip(stages, w_refs):
            hin, win = cur.shape[1], cur.shape[2]
            hout = hin - dh * (kh - 1)
            wout = win - dw * (kw - 1)
            w = w_ref[...].astype(jnp.float32)            # (kh*kw, cin)
            acc = jnp.zeros((cur.shape[0], hout, wout, cin), jnp.float32)
            for i in range(kh):
                for j in range(kw):
                    tap = w[i * kw + j, :]                # (cin,) on lanes
                    acc = acc + (
                        cur[:, i * dh:i * dh + hout, j * dw:j * dw + wout, :]
                        * tap)
            cur = acc

        # Grouped 1x1 pointwise conv with stride: subsample first (positions
        # 0, s, 2s, ...), then one MXU matmul against the block-diagonal weight.
        if stride > 1:
            bb, hc, wc, _ = cur.shape
            cur = cur.reshape(bb, hc // stride, stride, wc // stride, stride,
                              cin)[:, :, 0, :, 0, :]
        bb, hc, wc, _ = cur.shape
        flat = cur.reshape(bb * hc * wc, cin)
        y = jnp.dot(flat, wpw_ref[...], preferred_element_type=jnp.float32)
        y = y.reshape(bb, hc, wc, cout)
        if residual:
            y = y + x_ref[...].astype(jnp.float32)
        o_ref[...] = y.astype(out_dtype)

    return kernel


def _choose_batch_block(batch, per_batch_bytes, target_bytes=4 << 20):
    """Largest divisor of `batch` whose block stays under `target_bytes` while
    keeping >= 2 grid steps when possible (megacore / v7x dual TensorCore)."""
    best = 1
    for d in range(1, batch + 1):
        if batch % d:
            continue
        if d * per_batch_bytes > target_bytes:
            break
        if batch // d >= 2 or batch == 1:
            best = d
    return best


def jetconv_forward(x, dw_weights, pw_weight, cfg):
    """Fused JetConv forward. x: (B, in_ch, H, W) NCHW (PyTorch layout)."""
    B, C, H, W = x.shape
    in_ch, out_ch = cfg["in_ch"], cfg["out_ch"]
    groups, s, residual = cfg["groups"], cfg["s"], cfg["residual"]
    stages = cfg["stages"]
    assert C == in_ch, "channel mismatch"

    # All per-stage padding is hoisted to a single VMEM pad. Exact for the
    # configurations JetConv builds: one standard depthwise conv, or an
    # asymmetric (k,1) + (1,k) pair (each stage mixes only one spatial axis).
    if len(stages) == 2:
        assert stages[0][3] == 1 and stages[1][2] == 1, \
            "asymmetric pair expected: (k,1) then (1,k)"
    ph_tot = sum(st[0] for st in stages)
    pw_tot = sum(st[1] for st in stages)

    # Spatial dims after the depthwise stage(s) (stride-1 valid conv on the
    # padded input == PyTorch per-op zero padding).
    Hd, Wd = H + 2 * ph_tot, W + 2 * pw_tot
    for (_, _, kh, kw, dh, dw) in stages:
        Hd -= dh * (kh - 1)
        Wd -= dw * (kw - 1)
    if s > 1 and (Hd % s or Wd % s):
        # TODO(synk): general stride needs a strided subsample in-kernel; only
        # the divisible case is implemented.
        raise NotImplementedError("stride must divide the depthwise output")
    Ho = (Hd - 1) // s + 1
    Wo = (Wd - 1) // s + 1
    if residual:
        assert out_ch == in_ch and Ho == H and Wo == W, \
            "residual add needs matching shapes"

    # NHWC: channels on the 128-lane axis.
    x_nhwc = jnp.transpose(x, (0, 2, 3, 1))

    # Depthwise weights (in_ch,1,kh,kw) -> (kh*kw, in_ch): taps on sublanes,
    # channels on lanes (no in-kernel relayout of the tap vectors).
    dw_k = [w.reshape(in_ch, -1).T.astype(jnp.float32) for w in dw_weights]
    wpw = _grouped_pointwise_dense(pw_weight, in_ch, out_ch, groups)

    itemsize = x.dtype.itemsize
    per_batch_bytes = (H * W * in_ch + Ho * Wo * out_ch) * itemsize
    Bb = _choose_batch_block(B, per_batch_bytes)
    grid = (B // Bb,)

    Hp, Wp = H + 2 * ph_tot, W + 2 * pw_tot
    pad_bytes = Bb * Hp * Wp * in_ch * 4
    w_bytes = (sum(kh * kw for (_, _, kh, kw, _, _) in stages) * in_ch
               + in_ch * out_ch) * 4
    est = 4 * Bb * per_batch_bytes + 4 * pad_bytes + w_bytes + (4 << 20)
    vmem_limit = int(min(64 << 20, max(16 << 20, est)))   # safe on v7x (64 MiB)

    kernel = _make_jetconv_kernel(stages, ph_tot, pw_tot, H, W, in_ch, out_ch,
                                  s, residual, x.dtype)

    in_specs = [pl.BlockSpec((Bb, H, W, in_ch), lambda b: (b, 0, 0, 0))]
    for (_, _, kh, kw, _, _) in stages:
        in_specs.append(pl.BlockSpec((kh * kw, in_ch), lambda b: (0, 0)))
    in_specs.append(pl.BlockSpec((in_ch, out_ch), lambda b: (0, 0)))

    out_nhwc = pl.pallas_call(
        kernel,
        out_shape=jax.ShapeDtypeStruct((B, Ho, Wo, out_ch), x.dtype),
        grid_spec=pltpu.PrefetchScalarGridSpec(
            num_scalar_prefetch=0,
            grid=grid,
            in_specs=in_specs,
            out_specs=pl.BlockSpec((Bb, Ho, Wo, out_ch),
                                   lambda b: (b, 0, 0, 0)),
            scratch_shapes=[pltpu.VMEM((Bb, Hp, Wp, in_ch), jnp.float32)],
        ),
        compiler_params=pltpu.CompilerParams(
            dimension_semantics=("parallel",),
            vmem_limit_bytes=vmem_limit),
    )(x_nhwc, *dw_k, wpw)

    return jnp.transpose(out_nhwc, (0, 3, 1, 2))


# ----------------------------------------------------------------------------
# Pure-JAX reference (matches the PyTorch module)
# ----------------------------------------------------------------------------
def jetconv_reference(x, dw_weights, pw_weight, cfg):
    in_ch, groups = cfg["in_ch"], cfg["groups"]
    s, residual = cfg["s"], cfg["residual"]
    y = x
    for (ph, pw, kh, kw, dh, dw), w in zip(cfg["stages"], dw_weights):
        y = lax.conv_general_dilated(
            y, w, window_strides=(1, 1), padding=((ph, ph), (pw, pw)),
            rhs_dilation=(dh, dw),
            dimension_numbers=("NCHW", "OIHW", "NCHW"),
            feature_group_count=in_ch)
    out = lax.conv_general_dilated(
        y, pw_weight, window_strides=(s, s), padding=((0, 0), (0, 0)),
        dimension_numbers=("NCHW", "OIHW", "NCHW"),
        feature_group_count=groups)
    if residual:
        out = out + x
    return out


if __name__ == "__main__":
    key = jax.random.PRNGKey(0)
    k_x1, k_p1, k_x2, k_p2 = jax.random.split(key, 4)

    # --- Config 1: asymmetric jsc [[(1,5),(5,1)]], in_ch != out_ch ----------
    B, in_ch, out_ch, H, W = 2, 8, 16, 16, 16
    cfg1 = jetconv_config((W, H), in_ch, out_ch, s=1, residual=False,
                          jsc=[[(1, 5), (5, 1)]])
    dw1, pw1 = init_jetconv_params(k_p1, cfg1)
    x1 = jax.random.normal(k_x1, (B, in_ch, H, W), dtype=jnp.float32)

    out1 = jax.block_until_ready(jetconv_forward(x1, dw1, pw1, cfg1))
    ref1 = jetconv_reference(x1, dw1, pw1, cfg1)
    assert out1.shape == ref1.shape == (B, out_ch, H, W), out1.shape
    assert jnp.allclose(out1, ref1, atol=1e-4, rtol=1e-4), "cfg1 mismatch"

    # --- Config 2: standard jsc [[(3,3)]], residual, in_ch == out_ch --------
    B2, ch2, H2, W2 = 2, 16, 16, 16
    cfg2 = jetconv_config((W2, H2), ch2, ch2, s=1, residual=True,
                          jsc=[[(3, 3)]])
    dw2, pw2 = init_jetconv_params(k_p2, cfg2)
    x2 = jax.random.normal(k_x2, (B2, ch2, H2, W2), dtype=jnp.float32)

    out2 = jax.block_until_ready(jetconv_forward(x2, dw2, pw2, cfg2))
    ref2 = jetconv_reference(x2, dw2, pw2, cfg2)
    assert out2.shape == ref2.shape == (B2, ch2, H2, W2), out2.shape
    assert jnp.allclose(out2, ref2, atol=1e-4, rtol=1e-4), "cfg2 mismatch"

    print("KERNEL_OK")
</pallas_src>

<mosaic_0001>
module attributes {stable_mosaic.version = 11 : i64} {
  func.func @kernel(%arg0: i32, %arg1: memref<1x16x16x8xf32, #tpu.memory_space<vmem>>, %arg2: memref<5x8xf32, #tpu.memory_space<vmem>>, %arg3: memref<5x8xf32, #tpu.memory_space<vmem>>, %arg4: memref<8x16xf32, #tpu.memory_space<vmem>>, %arg5: memref<1x16x16x16xf32, #tpu.memory_space<vmem>>, %arg6: memref<1x24x24x8xf32, #tpu.memory_space<vmem>>) attributes {dimension_semantics = [#tpu.dimension_semantics<parallel>], iteration_bounds = array<i64: 2>, scalar_prefetch = 0 : i64, scratch_operands = 1 : i64, tpu.core_type = #tpu.core_type<tc>, window_params = [{transform_indices = @transform_0, window_bounds = array<i64: 1, 16, 16, 8>}, {pipeline_mode = #tpu.pipeline_mode<synchronous>, transform_indices = @transform_1, window_bounds = array<i64: 5, 8>}, {pipeline_mode = #tpu.pipeline_mode<synchronous>, transform_indices = @transform_2, window_bounds = array<i64: 5, 8>}, {pipeline_mode = #tpu.pipeline_mode<synchronous>, transform_indices = @transform_3, window_bounds = array<i64: 8, 16>}, {transform_indices = @transform_4, window_bounds = array<i64: 1, 16, 16, 16>}]} {
    %cst = arith.constant 0.000000e+00 : f32
    %0 = vector.broadcast %cst : f32 to vector<1x24x24x8xf32>
    %c0 = arith.constant 0 : index
    %c0_0 = arith.constant 0 : index
    %c0_1 = arith.constant 0 : index
    %c0_2 = arith.constant 0 : index
    %1 = vector.load %arg6[%c0, %c0_0, %c0_1, %c0_2] : memref<1x24x24x8xf32, #tpu.memory_space<vmem>>, vector<1x24x24x8xf32>
    tpu.vector_store %arg6[%c0, %c0_0, %c0_1, %c0_2], %0 {strides = array<i32>} : memref<1x24x24x8xf32, #tpu.memory_space<vmem>>, vector<1x24x24x8xf32>,
    %c0_3 = arith.constant 0 : index
    %c0_4 = arith.constant 0 : index
    %c0_5 = arith.constant 0 : index
    %c0_6 = arith.constant 0 : index
    %2 = vector.load %arg1[%c0_3, %c0_4, %c0_5, %c0_6] : memref<1x16x16x8xf32, #tpu.memory_space<vmem>>, vector<1x16x16x8xf32>
    %c0_7 = arith.constant 0 : index
    %c4 = arith.constant 4 : index
    %c4_8 = arith.constant 4 : index
    %c0_9 = arith.constant 0 : index
    %3 = vector.load %arg6[%c0_7, %c4, %c4_8, %c0_9] : memref<1x24x24x8xf32, #tpu.memory_space<vmem>>, vector<1x16x16x8xf32>
    tpu.vector_store %arg6[%c0_7, %c4, %c4_8, %c0_9], %2 {strides = array<i32>} : memref<1x24x24x8xf32, #tpu.memory_space<vmem>>, vector<1x16x16x8xf32>,
    %c0_10 = arith.constant 0 : index
    %c0_11 = arith.constant 0 : index
    %c0_12 = arith.constant 0 : index
    %c0_13 = arith.constant 0 : index
    %4 = vector.load %arg6[%c0_10, %c0_11, %c0_12, %c0_13] : memref<1x24x24x8xf32, #tpu.memory_space<vmem>>, vector<1x24x24x8xf32>
    %c0_14 = arith.constant 0 : index
    %c0_15 = arith.constant 0 : index
    %5 = vector.load %arg2[%c0_14, %c0_15] : memref<5x8xf32, #tpu.memory_space<vmem>>, vector<5x8xf32>
    %cst_16 = arith.constant 0.000000e+00 : f32
    %6 = vector.broadcast %cst_16 : f32 to vector<1x16x24x8xf32>
    %7 = vector.extract_strided_slice %5 {offsets = [0, 0], sizes = [1, 8], strides = [1, 1]} : vector<5x8xf32> to vector<1x8xf32>
    %8 = vector.shape_cast %7 : vector<1x8xf32> to vector<8xf32>
    %9 = vector.extract_strided_slice %4 {offsets = [0, 0, 0, 0], sizes = [1, 16, 24, 8], strides = [1, 1, 1, 1]} : vector<1x24x24x8xf32> to vector<1x16x24x8xf32>
    %10 = vector.shape_cast %8 : vector<8xf32> to vector<1x1x1x8xf32>
    %11 = vector.broadcast %10 : vector<1x1x1x8xf32> to vector<1x16x24x8xf32>
    %12 = arith.mulf %9, %11 : vector<1x16x24x8xf32>
    %13 = arith.addf %6, %12 : vector<1x16x24x8xf32>
    %14 = vector.extract_strided_slice %5 {offsets = [1, 0], sizes = [1, 8], strides = [1, 1]} : vector<5x8xf32> to vector<1x8xf32>
    %15 = vector.shape_cast %14 : vector<1x8xf32> to vector<8xf32>
    %16 = vector.extract_strided_slice %4 {offsets = [0, 2, 0, 0], sizes = [1, 16, 24, 8], strides = [1, 1, 1, 1]} : vector<1x24x24x8xf32> to vector<1x16x24x8xf32>
    %17 = vector.shape_cast %15 : vector<8xf32> to vector<1x1x1x8xf32>
    %18 = vector.broadcast %17 : vector<1x1x1x8xf32> to vector<1x16x24x8xf32>
    %19 = arith.mulf %16, %18 : vector<1x16x24x8xf32>
    %20 = arith.addf %13, %19 : vector<1x16x24x8xf32>
    %21 = vector.extract_strided_slice %5 {offsets = [2, 0], sizes = [1, 8], strides = [1, 1]} : vector<5x8xf32> to vector<1x8xf32>
    %22 = vector.shape_cast %21 : vector<1x8xf32> to vector<8xf32>
    %23 = vector.extract_strided_slice %4 {offsets = [0, 4, 0, 0], sizes = [1, 16, 24, 8], strides = [1, 1, 1, 1]} : vector<1x24x24x8xf32> to vector<1x16x24x8xf32>
    %24 = vector.shape_cast %22 : vector<8xf32> to vector<1x1x1x8xf32>
    %25 = vector.broadcast %24 : vector<1x1x1x8xf32> to vector<1x16x24x8xf32>
    %26 = arith.mulf %23, %25 : vector<1x16x24x8xf32>
    %27 = arith.addf %20, %26 : vector<1x16x24x8xf32>
    %28 = vector.extract_strided_slice %5 {offsets = [3, 0], sizes = [1, 8], strides = [1, 1]} : vector<5x8xf32> to vector<1x8xf32>
    %29 = vector.shape_cast %28 : vector<1x8xf32> to vector<8xf32>
    %30 = vector.extract_strided_slice %4 {offsets = [0, 6, 0, 0], sizes = [1, 16, 24, 8], strides = [1, 1, 1, 1]} : vector<1x24x24x8xf32> to vector<1x16x24x8xf32>
    %31 = vector.shape_cast %29 : vector<8xf32> to vector<1x1x1x8xf32>
    %32 = vector.broadcast %31 : vector<1x1x1x8xf32> to vector<1x16x24x8xf32>
    %33 = arith.mulf %30, %32 : vector<1x16x24x8xf32>
    %34 = arith.addf %27, %33 : vector<1x16x24x8xf32>
    %35 = vector.extract_strided_slice %5 {offsets = [4, 0], sizes = [1, 8], strides = [1, 1]} : vector<5x8xf32> to vector<1x8xf32>
    %36 = vector.shape_cast %35 : vector<1x8xf32> to vector<8xf32>
    %37 = vector.extract_strided_slice %4 {offsets = [0, 8, 0, 0], sizes = [1, 16, 24, 8], strides = [1, 1, 1, 1]} : vector<1x24x24x8xf32> to vector<1x16x24x8xf32>
    %38 = vector.shape_cast %36 : vector<8xf32> to vector<1x1x1x8xf32>
    %39 = vector.broadcast %38 : vector<1x1x1x8xf32> to vector<1x16x24x8xf32>
    %40 = arith.mulf %37, %39 : vector<1x16x24x8xf32>
    %41 = arith.addf %34, %40 : vector<1x16x24x8xf32>
    %c0_17 = arith.constant 0 : index
    %c0_18 = arith.constant 0 : index
    %42 = vector.load %arg3[%c0_17, %c0_18] : memref<5x8xf32, #tpu.memory_space<vmem>>, vector<5x8xf32>
    %cst_19 = arith.constant 0.000000e+00 : f32
    %43 = vector.broadcast %cst_19 : f32 to vector<1x16x16x8xf32>
    %44 = vector.extract_strided_slice %42 {offsets = [0, 0], sizes = [1, 8], strides = [1, 1]} : vector<5x8xf32> to vector<1x8xf32>
    %45 = vector.shape_cast %44 : vector<1x8xf32> to vector<8xf32>
    %46 = vector.extract_strided_slice %41 {offsets = [0, 0, 0, 0], sizes = [1, 16, 16, 8], strides = [1, 1, 1, 1]} : vector<1x16x24x8xf32> to vector<1x16x16x8xf32>
    %47 = vector.shape_cast %45 : vector<8xf32> to vector<1x1x1x8xf32>
    %48 = vector.broadcast %47 : vector<1x1x1x8xf32> to vector<1x16x16x8xf32>
    %49 = arith.mulf %46, %48 : vector<1x16x16x8xf32>
    %50 = arith.addf %43, %49 : vector<1x16x16x8xf32>
    %51 = vector.extract_strided_slice %42 {offsets = [1, 0], sizes = [1, 8], strides = [1, 1]} : vector<5x8xf32> to vector<1x8xf32>
    %52 = vector.shape_cast %51 : vector<1x8xf32> to vector<8xf32>
    %53 = vector.extract_strided_slice %41 {offsets = [0, 0, 2, 0], sizes = [1, 16, 16, 8], strides = [1, 1, 1, 1]} : vector<1x16x24x8xf32> to vector<1x16x16x8xf32>
    %54 = vector.shape_cast %52 : vector<8xf32> to vector<1x1x1x8xf32>
    %55 = vector.broadcast %54 : vector<1x1x1x8xf32> to vector<1x16x16x8xf32>
    %56 = arith.mulf %53, %55 : vector<1x16x16x8xf32>
    %57 = arith.addf %50, %56 : vector<1x16x16x8xf32>
    %58 = vector.extract_strided_slice %42 {offsets = [2, 0], sizes = [1, 8], strides = [1, 1]} : vector<5x8xf32> to vector<1x8xf32>
    %59 = vector.shape_cast %58 : vector<1x8xf32> to vector<8xf32>
    %60 = vector.extract_strided_slice %41 {offsets = [0, 0, 4, 0], sizes = [1, 16, 16, 8], strides = [1, 1, 1, 1]} : vector<1x16x24x8xf32> to vector<1x16x16x8xf32>
    %61 = vector.shape_cast %59 : vector<8xf32> to vector<1x1x1x8xf32>
    %62 = vector.broadcast %61 : vector<1x1x1x8xf32> to vector<1x16x16x8xf32>
    %63 = arith.mulf %60, %62 : vector<1x16x16x8xf32>
    %64 = arith.addf %57, %63 : vector<1x16x16x8xf32>
    %65 = vector.extract_strided_slice %42 {offsets = [3, 0], sizes = [1, 8], strides = [1, 1]} : vector<5x8xf32> to vector<1x8xf32>
    %66 = vector.shape_cast %65 : vector<1x8xf32> to vector<8xf32>
    %67 = vector.extract_strided_slice %41 {offsets = [0, 0, 6, 0], sizes = [1, 16, 16, 8], strides = [1, 1, 1, 1]} : vector<1x16x24x8xf32> to vector<1x16x16x8xf32>
    %68 = vector.shape_cast %66 : vector<8xf32> to vector<1x1x1x8xf32>
    %69 = vector.broadcast %68 : vector<1x1x1x8xf32> to vector<1x16x16x8xf32>
    %70 = arith.mulf %67, %69 : vector<1x16x16x8xf32>
    %71 = arith.addf %64, %70 : vector<1x16x16x8xf32>
    %72 = vector.extract_strided_slice %42 {offsets = [4, 0], sizes = [1, 8], strides = [1, 1]} : vector<5x8xf32> to vector<1x8xf32>
    %73 = vector.shape_cast %72 : vector<1x8xf32> to vector<8xf32>
    %74 = vector.extract_strided_slice %41 {offsets = [0, 0, 8, 0], sizes = [1, 16, 16, 8], strides = [1, 1, 1, 1]} : vector<1x16x24x8xf32> to vector<1x16x16x8xf32>
    %75 = vector.shape_cast %73 : vector<8xf32> to vector<1x1x1x8xf32>
    %76 = vector.broadcast %75 : vector<1x1x1x8xf32> to vector<1x16x16x8xf32>
    %77 = arith.mulf %74, %76 : vector<1x16x16x8xf32>
    %78 = arith.addf %71, %77 : vector<1x16x16x8xf32>
    %79 = vector.shape_cast %78 : vector<1x16x16x8xf32> to vector<256x8xf32>
    %c0_20 = arith.constant 0 : index
    %c0_21 = arith.constant 0 : index
    %80 = vector.load %arg4[%c0_20, %c0_21] : memref<8x16xf32, #tpu.memory_space<vmem>>, vector<8x16xf32>
    %cst_22 = arith.constant dense<0.000000e+00> : vector<256x16xf32>
    %81 = tpu.matmul %79, %80, %cst_22 {dimension_numbers = #tpu.dot_dimension_numbers<[1], [0], [0], [1], [0, 0, 1, 1], [], []>} : vector<256x8xf32>, vector<8x16xf32>, vector<256x16xf32> -> vector<256x16xf32>
    %82 = vector.shape_cast %81 : vector<256x16xf32> to vector<1x16x16x16xf32>
    %c0_23 = arith.constant 0 : index
    %c0_24 = arith.constant 0 : index
    %c0_25 = arith.constant 0 : index
    %c0_26 = arith.constant 0 : index
    %83 = vector.load %arg5[%c0_23, %c0_24, %c0_25, %c0_26] : memref<1x16x16x16xf32, #tpu.memory_space<vmem>>, vector<1x16x16x16xf32>
    tpu.vector_store %arg5[%c0_23, %c0_24, %c0_25, %c0_26], %82 {strides = array<i32>} : memref<1x16x16x16xf32, #tpu.memory_space<vmem>>, vector<1x16x16x16xf32>,
    return
  }
  func.func @transform_0(%arg0: i32) -> (i32, i32, i32, i32) {
    %c0_i32 = arith.constant 0 : i32
    %c0_i32_0 = arith.constant 0 : i32
    %c0_i32_1 = arith.constant 0 : i32
    %c0_i32_2 = arith.constant 0 : i32
    return %arg0, %c0_i32, %c0_i32_0, %c0_i32_1 : i32, i32, i32, i32
  }
  func.func @transform_1(%arg0: i32) -> (i32, i32) {
    %c0_i32 = arith.constant 0 : i32
    %c0_i32_0 = arith.constant 0 : i32
    %c0_i32_1 = arith.constant 0 : i32
    return %c0_i32, %c0_i32_0 : i32, i32
  }
  func.func @transform_2(%arg0: i32) -> (i32, i32) {
    %c0_i32 = arith.constant 0 : i32
    %c0_i32_0 = arith.constant 0 : i32
    %c0_i32_1 = arith.constant 0 : i32
    return %c0_i32, %c0_i32_0 : i32, i32
  }
  func.func @transform_3(%arg0: i32) -> (i32, i32) {
    %c0_i32 = arith.constant 0 : i32
    %c0_i32_0 = arith.constant 0 : i32
    %c0_i32_1 = arith.constant 0 : i32
    return %c0_i32, %c0_i32_0 : i32, i32
  }
  func.func @transform_4(%arg0: i32) -> (i32, i32, i32, i32) {
    %c0_i32 = arith.constant 0 : i32
    %c0_i32_0 = arith.constant 0 : i32
    %c0_i32_1 = arith.constant 0 : i32
    %c0_i32_2 = arith.constant 0 : i32
    return %arg0, %c0_i32, %c0_i32_0, %c0_i32_1 : i32, i32, i32, i32
  }
}

</mosaic_0001>

<bundles_post_ra>
// kernel: tpu_custom_call.1
= control target key start
LH: loop header
LB: loop body
LE: loop exit
PB: predicated region body
PF: predicated region fallthrough
CT: control target
= control target key end

     0   :  { %9 = vsyncpa [#allocation4], 0  ;;  %s3968_s0 = inlined_call_operand.vmem [shape: f32[2,16,16,8], index: 0, kind: input, shape index: {}]   ;;  %s3969_s1 = inlined_call_operand.vmem [shape: f32[5,8], index: 1, kind: input, shape index: {}]   ;;  %s3970_s2 = inlined_call_operand.vmem [shape: f32[5,8], index: 2, kind: input, shape index: {}]   ;;  %s3971_s3 = inlined_call_operand.vmem [shape: f32[8,16], index: 3, kind: input, shape index: {}]   ;;  %s3972_s4 = inlined_call_operand.hbm [shape: f32[2,16,16,16], index: 4, kind: output, shape index: {}]  }
   0x1   :  { %11 = vsyncpa [#allocation4 + $0x1], 0  ;;  %s2518_s15 = smov 0   ;;  %s2520_s16 = smov 0  }
   0x2   :  { %s2522_s17 = smov 0   ;;  %s2524_s18 = smov 0  }
   0x3 LB: > { %s2539_s19 = sadd.s32 4294967295, %s2487_s18   ;;  %s2210_s20 = sadd.s32 4294967294, %s2487_s18   ;;  %s2487_s18 = sphi %s2524_s18, %s4101_s18   ;;  %s2483_s17 = sphi %s2522_s17, %s4100_s17   ;;  %s2479_s16 = sphi %s2520_s16, %s4099_s16   ;;  %s2475_s15 = sphi %s2518_s15, %s4098_s15  }
   0x4   : > { %s2543_s21 = sadd.s32 1, %s2487_s18   ;;  %s113_s22 = sadd.s32 1, %s2483_s17 }
   0x5   : > { %s110_s23 = ssub.s32 %s2487_s18, %s2543_s21  ;;  %p123_p0 = scmp.ne.s32.totalorder %s2483_s17, %s2479_s16 }
   0x6   : > { %p111_p1 = scmp.eq.s32.totalorder %s110_s23, 0  ;;  %p124_p2 = scmp.eq.s32.totalorder %s2539_s19, 1 }
   0x7   : > { %p129_p3 = scmp.ne.s32.totalorder %s2479_s16, %s2475_s15  ;;  %p130_p4 = scmp.eq.s32.totalorder %s2210_s20, 1 }
   0x8   : > { %s2554_s24 = scalar_select %p111_p1, %s2483_s17, %s113_s22  }
   0x9   : > { %p2556_p5 = por %p124_p2, %p123_p0  ;;  %p2560_p6 = por %p130_p4, %p129_p3 }
   0xa   : > { %p2213_p7 = scmp.ge.s32.totalorder %s2487_s18, 1  ;;  %p165_p8 = scmp.lt.s32.totalorder %s2487_s18, 3 }
   0xc   : > { %p166_p9 = pnand %p2213_p7, %p165_p8 }
   0xe   : > { %169 = sbr.rel (%p166_p9) target bundleno = 557 (0x22d), region = 36 }
  0x15   : > { %v2569_v0 = vld [vmem:[%s3971_s3] sm:$0xff]  ;;  %p191_p10 = scmp.lt.s32.totalorder %s2539_s19, 1  ;;  %vm196_vm0 = vcmask 64512   ;;  %v407_v1 = vlaneseq  ;;  %v2489_v2 = vmov 0.0   ;;  %vm1076_vm1 = vcmask 1045504   ;;  %s188_s12 = sand.u32 1, %s2479_s16  }
  0x16   : > { %2289 = vmatprep.subr.mxu0 %v2569_v0  ;;  %2339 = vmatprep.subr.mxu1 %v2569_v0  ;;  %197 = vst.msk [vmem:[#allocation2] sm:$0xff] %vm196_vm0, %v2489_v2  ;;  %198 = vst.msk [vmem:[#allocation2 + $0x8] sm:$0xff] %vm196_vm0, %v2489_v2  ;;  %v406_v4 = vld [vmem:[%s3969_s1] sm:$0x1f]  ;;  %vm1321_vm2 = vcmask 1043456   ;;  %vm1566_vm3 = vcmask 1041408  }
  0x17   : > { %203 = vst.msk [vmem:[#allocation2 + $0x30] sm:$0xff] %vm196_vm0, %v2489_v2  ;;  %204 = vst.msk [vmem:[#allocation2 + $0x38] sm:$0xff] %vm196_vm0, %v2489_v2  ;;  %2290 = vmatpush3.msra.mxu0 %v2569_v0  ;;  %s192_s29 = scalar_select %p191_p10, %s2539_s19, 1  ;;  %v408_v3 = vshrl.u32 %v407_v1, 7  ;;  %2340 = vmatpush3.msra.mxu1 %v2569_v0  ;;  %v907_v16 = vld [vmem:[%s3970_s2] sm:$0x1f] }
  0x18   : > { %209 = vst.msk [vmem:[#allocation2 + $0x60] sm:$0xff] %vm196_vm0, %v2489_v2  ;;  %210 = vst.msk [vmem:[#allocation2 + $0x68] sm:$0xff] %vm196_vm0, %v2489_v2  ;;  %s2214_s13 = sshll.u32 %s188_s12, 8  ;;  %vm2101_vm4 = vcmask 130048   ;;  %s2255_s20 = sshll.u32 %s2539_s19, 12 }
  0x19   : > { %211 = vst.msk [vmem:[#allocation2 + $0x70] sm:$0xff] %vm196_vm0, %v2489_v2  ;;  %215 = vst.msk [vmem:[#allocation2 + $0x90] sm:$0xff] %vm196_vm0, %v2489_v2  ;;  %s2254_s6 = sshll.u32 %s192_s29, 8  ;;  %v409_v5 = vsub.s32 0, %v408_v3  ;;  %v509_v6 = vsub.s32 1, %v408_v3  ;;  %v609_v15 = vsub.s32 2, %v408_v3  ;;  %s3917_s28 = scalar_lea.hbm %s3972_s4, %s2255_s20 }
  0x1a   : > { %216 = vst.msk [vmem:[#allocation2 + $0x98] sm:$0xff] %vm196_vm0, %v2489_v2  ;;  %217 = vst.msk [vmem:[#allocation2 + $0xa0] sm:$0xff] %vm196_vm0, %v2489_v2  ;;  %s2730_s9 = scalar_lea.vmem %s3968_s0, %s2254_s6  ;;  %v709_v20 = vsub.s32 3, %v408_v3  ;;  %v809_v21 = vsub.s32 4, %v408_v3  ;;  %s3829_s14 = scalar_lea.vmem [#allocation3], %s2214_s13 }
  0x1b   : > { %221 = vst.msk [vmem:[#allocation2 + $0xc0] sm:$0xff] %vm196_vm0, %v2489_v2  ;;  %222 = vst.msk [vmem:[#allocation2 + $0xc8] sm:$0xff] %vm196_vm0, %v2489_v2  ;;  %v269_v7 = vld [vmem:[%s2730_s9] sm:$0xff]  ;;  %v270_v8 = vld [vmem:[%s2730_s9 + $0x8] sm:$0xff]  ;;  %v2735_v10 = vrot.slane %v406_v4, %v409_v5  ;;  %v2737_v11 = vrot.slane %v406_v4, %v509_v6  ;;  %v2758_v32 = vrot.slane %v406_v4, %v609_v15  ;;  %s2148_s22 = sshll.u32 %s3829_s14, 4  ;;  %s3927_s29 = scalar_lea.sflag [#allocation4], %s188_s12  ;;  %s3919_s22 = int_to_ptr.vmem [resolvable:$true] %s2148_s22 }
  0x1c   : > { %223 = vst.msk [vmem:[#allocation2 + $0xd0] sm:$0xff] %vm196_vm0, %v2489_v2  ;;  %199 = vst.msk [vmem:[#allocation2 + $0x10] sm:$0xff] %vm196_vm0, %v2489_v2  ;;  %v273_v9 = vld [vmem:[%s2730_s9 + $0x20] sm:$0xff]  ;;  %v274_v12 = vld [vmem:[%s2730_s9 + $0x28] sm:$0xff]  ;;  %v2768_v38 = vrot.slane %v406_v4, %v709_v20  ;;  %v2770_v39 = vrot.slane %v406_v4, %v809_v21  ;;  %v2772_v40 = vrot.slane %v907_v16, %v409_v5  ;;  %s2425_s19 = scalar_lea.vmem %s3919_s22, 4096  ;;  %s2490_s30 = smov [#allocation3]  }
  0x1d   : > { %200 = vst.msk [vmem:[#allocation2 + $0x18] sm:$0xff] %vm196_vm0, %v2489_v2  ;;  %201 = vst.msk [vmem:[#allocation2 + $0x20] sm:$0xff] %vm196_vm0, %v2489_v2  ;;  %v277_v13 = vld [vmem:[%s2730_s9 + $0x40] sm:$0xff]  ;;  %v278_v14 = vld [vmem:[%s2730_s9 + $0x48] sm:$0xff]  ;;  %v2774_v41 = vrot.slane %v907_v16, %v509_v6  ;;  %v2785_v46 = vrot.slane %v907_v16, %v609_v15  ;;  %v2787_v47 = vrot.slane %v907_v16, %v709_v20  ;;  %p2426_p11 = scmp.ne.s32.totalorder %s3919_s22, %s2425_s19  ;;  %s2429_s5 = sshll.u32 %s2490_s30, 4  ;;  %s2430_s5 = int_to_ptr.vmem [resolvable:$false] %s2429_s5 }
  0x1e   : > { %202 = vst.msk [vmem:[#allocation2 + $0x28] sm:$0xff] %vm196_vm0, %v2489_v2  ;;  %205 = vst.msk [vmem:[#allocation2 + $0x40] sm:$0xff] %vm196_vm0, %v2489_v2  ;;  %v334_v17 = vld [vmem:[#allocation2] sm:$0xff]  ;;  %v335_v18 = vld [vmem:[#allocation2 + $0x8] sm:$0xff]  ;;  %v2789_v48 = vrot.slane %v907_v16, %v809_v21  ;;  %s2431_s6 = scalar_lea.vmem %s2430_s5, 8192  ;;  %p2432_p0 = scmp.lt.s32.totalorder %s3919_s22, %s2430_s5 }
  0x1f   : > { %206 = vst.msk [vmem:[#allocation2 + $0x48] sm:$0xff] %vm196_vm0, %v2489_v2  ;;  %207 = vst.msk [vmem:[#allocation2 + $0x50] sm:$0xff] %vm196_vm0, %v2489_v2  ;;  %v340_v19 = vld [vmem:[#allocation2 + $0x30] sm:$0xff]  ;;  %v341_v22 = vld [vmem:[#allocation2 + $0x38] sm:$0xff]  ;;  %v411_v25 = vmul.f32 %v2735_v10, %v334_v17  ;;  %v412_v26 = vmul.f32 %v2735_v10, %v335_v18  ;;  %p2427_p12 = pnand %p2426_p11, %p2556_p5  ;;  %p2433_p1 = scmp.lt.s32.totalorder %s2431_s6, %s2425_s19 }
  0x20   : > { %208 = vst.msk [vmem:[#allocation2 + $0x58] sm:$0xff] %vm196_vm0, %v2489_v2  ;;  %212 = vst.msk [vmem:[#allocation2 + $0x78] sm:$0xff] %vm196_vm0, %v2489_v2  ;;  %v511_v27 = vmul.f32 %v2737_v11, %v340_v19  ;;  %v512_v28 = vmul.f32 %v2737_v11, %v341_v22  ;;  %v281_v29 = vld [vmem:[%s2730_s9 + $0x60] sm:$0xff]  ;;  %v282_v30 = vld [vmem:[%s2730_s9 + $0x68] sm:$0xff]  ;;  %v2783_v45 = vmul.f32 %v2735_v10, %v340_v19 }
  0x21   : > { %213 = vst.msk [vmem:[#allocation2 + $0x80] sm:$0xff] %vm196_vm0, %v2489_v2  ;;  %214 = vst.msk [vmem:[#allocation2 + $0x88] sm:$0xff] %vm196_vm0, %v2489_v2  ;;  %v285_v31 = vld [vmem:[%s2730_s9 + $0x80] sm:$0xff]  ;;  %v286_v35 = vld [vmem:[%s2730_s9 + $0x88] sm:$0xff]  ;;  %v2800_v55 = vmul.f32 %v2735_v10, %v341_v22  ;;  %p2428_p13 = pneg %p2427_p12  ;;  %p2434_p2 = por %p2433_p1, %p2432_p0 }
  0x22   : > { %218 = vst.msk [vmem:[#allocation2 + $0xa8] sm:$0xff] %vm196_vm0, %v2489_v2  ;;  %219 = vst.msk [vmem:[#allocation2 + $0xb0] sm:$0xff] %vm196_vm0, %v2489_v2  ;;  %v289_v36 = vld [vmem:[%s2730_s9 + $0xa0] sm:$0xff]  ;;  %v290_v37 = vld [vmem:[%s2730_s9 + $0xa8] sm:$0xff]  ;;  %v559_v56 = vadd.f32 %v511_v27, %v411_v25  ;;  %v560_v57 = vadd.f32 %v512_v28, %v412_v26 }
  0x23   : > { %220 = vst.msk [vmem:[#allocation2 + $0xb8] sm:$0xff] %vm196_vm0, %v2489_v2  ;;  %224 = vst.msk [vmem:[#allocation2 + $0xd8] sm:$0xff] %vm196_vm0, %v2489_v2  ;;  %v336_v23 = vld [vmem:[#allocation2 + $0x10] sm:$0xff]  ;;  %v293_v42 = vld [vmem:[%s2730_s9 + $0xc0] sm:$0xff]  ;;  %p2435_p3 = pnand %p2434_p2, %p2428_p13 }
  0x24   : > { %225 = vst.msk [vmem:[#allocation2 + $0xe0] sm:$0xff] %vm196_vm0, %v2489_v2  ;;  %226 = vst.msk [vmem:[#allocation2 + $0xe8] sm:$0xff] %vm196_vm0, %v2489_v2  ;;  %v413_v33 = vmul.f32 %v2735_v10, %v336_v23  ;;  %v294_v43 = vld [vmem:[%s2730_s9 + $0xc8] sm:$0xff]  ;;  %v271_v44 = vld [vmem:[%s2730_s9 + $0x10] sm:$0xff] }
  0x25   : > { %227 = vst.msk [vmem:[#allocation2 + $0xf0] sm:$0xff] %vm196_vm0, %v2489_v2  ;;  %228 = vst.msk [vmem:[#allocation2 + $0xf8] sm:$0xff] %vm196_vm0, %v2489_v2  ;;  %v342_v24 = vld [vmem:[#allocation2 + $0x40] sm:$0xff]  ;;  %v272_v49 = vld [vmem:[%s2730_s9 + $0x18] sm:$0xff] }
  0x26   : > { %229 = vst.msk [vmem:[#allocation2 + $0x100] sm:$0xff] %vm196_vm0, %v2489_v2  ;;  %230 = vst.msk [vmem:[#allocation2 + $0x108] sm:$0xff] %vm196_vm0, %v2489_v2  ;;  %v513_v34 = vmul.f32 %v2737_v11, %v342_v24  ;;  %v275_v50 = vld [vmem:[%s2730_s9 + $0x30] sm:$0xff]  ;;  %v276_v51 = vld [vmem:[%s2730_s9 + $0x38] sm:$0xff]  ;;  %v2806_v58 = vmul.f32 %v2735_v10, %v342_v24 }
  0x27   : > { %231 = vst.msk [vmem:[#allocation2 + $0x110] sm:$0xff] %vm196_vm0, %v2489_v2  ;;  %232 = vst.msk [vmem:[#allocation2 + $0x118] sm:$0xff] %vm196_vm0, %v2489_v2  ;;  %v280_v15 = vld [vmem:[%s2730_s9 + $0x58] sm:$0xff] }
  0x28   : > { %233 = vst.msk [vmem:[#allocation2 + $0x120] sm:$0xff] %vm196_vm0, %v2489_v2  ;;  %234 = vst.msk [vmem:[#allocation2 + $0x128] sm:$0xff] %vm196_vm0, %v2489_v2  ;;  %v561_v63 = vadd.f32 %v513_v34, %v413_v33 }
  0x29   : > { %235 = vst.msk [vmem:[#allocation2 + $0x130] sm:$0xff] %vm196_vm0, %v2489_v2  ;;  %236 = vst.msk [vmem:[#allocation2 + $0x138] sm:$0xff] %vm196_vm0, %v2489_v2 }
  0x2a   : > { %237 = vst.msk [vmem:[#allocation2 + $0x140] sm:$0xff] %vm196_vm0, %v2489_v2  ;;  %238 = vst.msk [vmem:[#allocation2 + $0x148] sm:$0xff] %vm196_vm0, %v2489_v2 }
  0x2b   : > { %239 = vst.msk [vmem:[#allocation2 + $0x150] sm:$0xff] %vm196_vm0, %v2489_v2  ;;  %240 = vst.msk [vmem:[#allocation2 + $0x158] sm:$0xff] %vm196_vm0, %v2489_v2 }
  0x2c   : > { %241 = vst.msk [vmem:[#allocation2 + $0x160] sm:$0xff] %vm196_vm0, %v2489_v2  ;;  %242 = vst.msk [vmem:[#allocation2 + $0x168] sm:$0xff] %vm196_vm0, %v2489_v2 }
  0x2d   : > { %243 = vst.msk [vmem:[#allocation2 + $0x170] sm:$0xff] %vm196_vm0, %v2489_v2  ;;  %244 = vst.msk [vmem:[#allocation2 + $0x178] sm:$0xff] %vm196_vm0, %v2489_v2 }
  0x2e   : > { %245 = vst.msk [vmem:[#allocation2 + $0x180] sm:$0xff] %vm196_vm0, %v2489_v2  ;;  %246 = vst.msk [vmem:[#allocation2 + $0x188] sm:$0xff] %vm196_vm0, %v2489_v2 }
  0x2f   : > { %247 = vst.msk [vmem:[#allocation2 + $0x190] sm:$0xff] %vm196_vm0, %v2489_v2  ;;  %248 = vst.msk [vmem:[#allocation2 + $0x198] sm:$0xff] %vm196_vm0, %v2489_v2 }
  0x30   : > { %249 = vst.msk [vmem:[#allocation2 + $0x1a0] sm:$0xff] %vm196_vm0, %v2489_v2  ;;  %250 = vst.msk [vmem:[#allocation2 + $0x1a8] sm:$0xff] %vm196_vm0, %v2489_v2 }
  0x31   : > { %251 = vst.msk [vmem:[#allocation2 + $0x1b0] sm:$0xff] %vm196_vm0, %v2489_v2  ;;  %252 = vst.msk [vmem:[#allocation2 + $0x1b8] sm:$0xff] %vm196_vm0, %v2489_v2 }
  0x32   : > { %253 = vst.msk [vmem:[#allocation2 + $0x1c0] sm:$0xff] %vm196_vm0, %v2489_v2  ;;  %254 = vst.msk [vmem:[#allocation2 + $0x1c8] sm:$0xff] %vm196_vm0, %v2489_v2 }
  0x33   : > { %255 = vst.msk [vmem:[#allocation2 + $0x1d0] sm:$0xff] %vm196_vm0, %v2489_v2  ;;  %256 = vst.msk [vmem:[#allocation2 + $0x1d8] sm:$0xff] %vm196_vm0, %v2489_v2 }
  0x34   : > { %257 = vst.msk [vmem:[#allocation2 + $0x1e0] sm:$0xff] %vm196_vm0, %v2489_v2  ;;  %258 = vst.msk [vmem:[#allocation2 + $0x1e8] sm:$0xff] %vm196_vm0, %v2489_v2 }
  0x35   : > { %259 = vst.msk [vmem:[#allocation2 + $0x1f0] sm:$0xff] %vm196_vm0, %v2489_v2  ;;  %260 = vst.msk [vmem:[#allocation2 + $0x1f8] sm:$0xff] %vm196_vm0, %v2489_v2 }
  0x36   : > { %261 = vst.msk [vmem:[#allocation2 + $0x200] sm:$0xff] %vm196_vm0, %v2489_v2  ;;  %262 = vst.msk [vmem:[#allocation2 + $0x208] sm:$0xff] %vm196_vm0, %v2489_v2 }
  0x37   : > { %263 = vst.msk [vmem:[#allocation2 + $0x210] sm:$0xff] %vm196_vm0, %v2489_v2  ;;  %264 = vst.msk [vmem:[#allocation2 + $0x218] sm:$0xff] %vm196_vm0, %v2489_v2 }
  0x38   : > { %265 = vst.msk [vmem:[#allocation2 + $0x220] sm:$0xff] %vm196_vm0, %v2489_v2  ;;  %266 = vst.msk [vmem:[#allocation2 + $0x228] sm:$0xff] %vm196_vm0, %v2489_v2 }
  0x39   : > { %267 = vst.msk [vmem:[#allocation2 + $0x230] sm:$0xff] %vm196_vm0, %v2489_v2  ;;  %268 = vst.msk [vmem:[#allocation2 + $0x238] sm:$0xff] %vm196_vm0, %v2489_v2 }
  0x3a   : > { %302 = vst.msk [vmem:[#allocation2 + $0x64] sm:$0xff] %vm196_vm0, %v269_v7  ;;  %303 = vst.msk [vmem:[#allocation2 + $0x6c] sm:$0xff] %vm196_vm0, %v270_v8 }
  0x3b   : > { %306 = vst.msk [vmem:[#allocation2 + $0x94] sm:$0xff] %vm196_vm0, %v273_v9  ;;  %307 = vst.msk [vmem:[#allocation2 + $0x9c] sm:$0xff] %vm196_vm0, %v274_v12 }
  0x3c   : > { %310 = vst.msk [vmem:[#allocation2 + $0xc4] sm:$0xff] %vm196_vm0, %v277_v13  ;;  %311 = vst.msk [vmem:[#allocation2 + $0xcc] sm:$0xff] %vm196_vm0, %v278_v14  ;;  %v279_v14 = vld [vmem:[%s2730_s9 + $0x50] sm:$0xff] }
  0x3d   : > { %314 = vst.msk [vmem:[#allocation2 + $0xf4] sm:$0xff] %vm196_vm0, %v281_v29  ;;  %315 = vst.msk [vmem:[#allocation2 + $0xfc] sm:$0xff] %vm196_vm0, %v282_v30 }
  0x3e   : > { %318 = vst.msk [vmem:[#allocation2 + $0x124] sm:$0xff] %vm196_vm0, %v285_v31  ;;  %319 = vst.msk [vmem:[#allocation2 + $0x12c] sm:$0xff] %vm196_vm0, %v286_v35 }
  0x3f   : > { %322 = vst.msk [vmem:[#allocation2 + $0x154] sm:$0xff] %vm196_vm0, %v289_v36  ;;  %323 = vst.msk [vmem:[#allocation2 + $0x15c] sm:$0xff] %vm196_vm0, %v290_v37 }
  0x40   : > { %326 = vst.msk [vmem:[#allocation2 + $0x184] sm:$0xff] %vm196_vm0, %v293_v42  ;;  %327 = vst.msk [vmem:[#allocation2 + $0x18c] sm:$0xff] %vm196_vm0, %v294_v43 }
  0x41   : > { %304 = vst.msk [vmem:[#allocation2 + $0x7c] sm:$0xff] %vm196_vm0, %v271_v44  ;;  %v346_v52 = vld [vmem:[#allocation2 + $0x60] sm:$0xff]  ;;  %v347_v53 = vld [vmem:[#allocation2 + $0x68] sm:$0xff]  ;;  %305 = vst.msk [vmem:[#allocation2 + $0x84] sm:$0xff] %vm196_vm0, %v272_v49 }
  0x42   : > { %v2797_v54 = vld [vmem:[#allocation2 + $0x90] sm:$0xff]  ;;  %308 = vst.msk [vmem:[#allocation2 + $0xac] sm:$0xff] %vm196_vm0, %v275_v50  ;;  %309 = vst.msk [vmem:[#allocation2 + $0xb4] sm:$0xff] %vm196_vm0, %v276_v51  ;;  %v2808_v59 = vld [vmem:[#allocation2 + $0x98] sm:$0xff]  ;;  %v2811_v60 = vmul.f32 %v2735_v10, %v346_v52  ;;  %v2814_v61 = vmul.f32 %v2735_v10, %v347_v53  ;;  %v2827_v2 = vmul.f32 %v2737_v11, %v346_v52 }
  0x43   : > { %v2818_v62 = vmul.f32 %v2735_v10, %v2797_v54  ;;  %v2820_v0 = vld [vmem:[#allocation2 + $0xc0] sm:$0xff]  ;;  %v2824_v1 = vmul.f32 %v2735_v10, %v2808_v59  ;;  %v2830_v3 = vmul.f32 %v2737_v11, %v347_v53  ;;  %v2834_v4 = vmul.f32 %v2737_v11, %v2797_v54  ;;  %v2836_v5 = vld [vmem:[#allocation2 + $0x70] sm:$0xff]  ;;  %v2840_v7 = vld [vmem:[#allocation2 + $0xc8] sm:$0xff]  ;;  %312 = vst.msk [vmem:[#allocation2 + $0xdc] sm:$0xff] %vm196_vm0, %v279_v14 }
  0x44   : > { %4014 = vst [vmem:[#allocation6_spill] sm:$0xff] %v2811_v60  ;;  %4015 = vst [vmem:[#allocation7_spill] sm:$0xff] %v2814_v61  ;;  %v2838_v6 = vld [vmem:[#allocation2 + $0xa0] sm:$0xff]  ;;  %v611_v8 = vmul.f32 %v2758_v32, %v346_v52  ;;  %v612_v9 = vmul.f32 %v2758_v32, %v347_v53  ;;  %v711_v12 = vmul.f32 %v2768_v38, %v2797_v54  ;;  %v2854_v18 = vld [vmem:[#allocation2 + $0xd0] sm:$0xff] }
  0x45   : > { %4016 = vst [vmem:[#allocation8_spill] sm:$0xff] %v2818_v62  ;;  %4017 = vst [vmem:[#allocation9_spill] sm:$0xff] %v2824_v1  ;;  %v712_v13 = vmul.f32 %v2768_v38, %v2808_v59  ;;  %v811_v16 = vmul.f32 %v2770_v39, %v2820_v0  ;;  %v812_v17 = vmul.f32 %v2770_v39, %v2840_v7  ;;  %v2860_v21 = vld [vmem:[#allocation2 + $0xf0] sm:$0xff]  ;;  %v2862_v22 = vld [vmem:[#allocation2 + $0xf8] sm:$0xff] }
  0x46   : > { %4018 = vst [vmem:[#allocation10_spill] sm:$0xff] %v2834_v4  ;;  %v613_v19 = vmul.f32 %v2758_v32, %v2836_v5  ;;  %v713_v20 = vmul.f32 %v2768_v38, %v2838_v6  ;;  %313 = vst.msk [vmem:[#allocation2 + $0xe4] sm:$0xff] %vm196_vm0, %v280_v15  ;;  %v659_v23 = vadd.f32 %v611_v8, %v559_v56  ;;  %v2868_v26 = vld [vmem:[#allocation2 + $0x120] sm:$0xff]  ;;  %v2872_v29 = vld [vmem:[#allocation2 + $0x128] sm:$0xff] }
  0x47   : > { %v660_v24 = vadd.f32 %v612_v9, %v560_v57  ;;  %v813_v25 = vmul.f32 %v2770_v39, %v2854_v18  ;;  %v435_v27 = vmul.f32 %v2735_v10, %v2820_v0  ;;  %v2874_v30 = vld [vmem:[#allocation2 + $0x180] sm:$0xff]  ;;  %v436_v31 = vmul.f32 %v2735_v10, %v2840_v7  ;;  %v2886_v42 = vld [vmem:[#allocation2 + $0x188] sm:$0xff]  ;;  %v2892_v49 = vld [vmem:[#allocation2 + $0x150] sm:$0xff] }
  0x48   : > { %v661_v28 = vadd.f32 %v613_v19, %v561_v63  ;;  %4019 = vst [vmem:[#allocation11_spill] sm:$0xff] %v2874_v30  ;;  %v535_v33 = vmul.f32 %v2737_v11, %v2860_v21  ;;  %v536_v34 = vmul.f32 %v2737_v11, %v2862_v22  ;;  %v2884_v35 = vmul.f32 %v2737_v11, %v2808_v59  ;;  %v299_v62 = vld [vmem:[%s2730_s9 + $0xf0] sm:$0xff] }
  0x49   : > { %v759_v36 = vadd.f32 %v711_v12, %v659_v23  ;;  %v760_v37 = vadd.f32 %v712_v13, %v660_v24  ;;  %4021 = vst [vmem:[#allocation13_spill] sm:$0xff] %v2886_v42  ;;  %v2890_v43 = vmul.f32 %v2737_v11, %v2874_v30  ;;  %v2896_v50 = vmul.f32 %v2737_v11, %v2886_v42 }
  0x4a   : > { %4020 = vst [vmem:[#allocation12_spill] sm:$0xff] %v2884_v35  ;;  %v761_v44 = vadd.f32 %v713_v20, %v661_v28  ;;  %v583_v51 = vadd.f32 %v535_v33, %v435_v27  ;;  %v635_v52 = vmul.f32 %v2758_v32, %v2868_v26  ;;  %v584_v57 = vadd.f32 %v536_v34, %v436_v31  ;;  %v283_v27 = vld [vmem:[%s2730_s9 + $0x70] sm:$0xff] }
  0x4b   : > { %4022 = vst [vmem:[#allocation14_spill] sm:$0xff] %v2890_v43  ;;  %4023 = vst [vmem:[#allocation15_spill] sm:$0xff] %v2896_v50  ;;  %v859_v53 = vadd.f32 %v811_v16, %v759_v36  ;;  %v860_v56 = vadd.f32 %v812_v17, %v760_v37  ;;  %v636_v63 = vmul.f32 %v2758_v32, %v2872_v29  ;;  %v284_v36 = vld [vmem:[%s2730_s9 + $0x78] sm:$0xff]  ;;  %v287_v37 = vld [vmem:[%s2730_s9 + $0x90] sm:$0xff] }
  0x4c   : > { %v2902_v8 = vadd.f32 %v813_v25, %v761_v44  ;;  %v2906_v9 = vmul.f32 %v2758_v32, %v2874_v30  ;;  %v2910_v12 = vmul.f32 %v2758_v32, %v2886_v42  ;;  %v683_v13 = vadd.f32 %v635_v52, %v583_v51  ;;  %v2921_v25 = vld [vmem:[#allocation2 + $0x158] sm:$0xff]  ;;  %316 = vst.msk [vmem:[#allocation2 + $0x10c] sm:$0xff] %vm196_vm0, %v283_v27  ;;  %v291_v43 = vld [vmem:[%s2730_s9 + $0xb0] sm:$0xff] }
  0x4d   : > { %v980_v14 = vmul.f32 %v2774_v41, %v859_v53  ;;  %v981_v15 = vmul.f32 %v2774_v41, %v860_v56  ;;  %v1225_v16 = vmul.f32 %v2785_v46, %v859_v53  ;;  %v735_v17 = vmul.f32 %v2768_v38, %v2892_v49  ;;  %v288_v44 = vld [vmem:[%s2730_s9 + $0x98] sm:$0xff]  ;;  %317 = vst.msk [vmem:[#allocation2 + $0x114] sm:$0xff] %vm196_vm0, %v284_v36  ;;  %v297_v36 = vld [vmem:[%s2730_s9 + $0xe0] sm:$0xff] }
  0x4e   : > { %4024 = vst [vmem:[#allocation16_spill] sm:$0xff] %v2906_v9  ;;  %4025 = vst [vmem:[#allocation17_spill] sm:$0xff] %v2910_v12  ;;  %v912_v19 = vmul.f32 %v2772_v40, %v859_v53  ;;  %v1226_v20 = vmul.f32 %v2785_v46, %v860_v56  ;;  %v1470_v23 = vmul.f32 %v2787_v47, %v859_v53  ;;  %v296_v27 = vld [vmem:[%s2730_s9 + $0xd8] sm:$0xff] }
  0x4f   : > { %v1471_v24 = vmul.f32 %v2787_v47, %v860_v56  ;;  %v1077_v28 = vrot.slane %v980_v14, 2  ;;  %v1078_v31 = vrot.slane %v981_v15, 2  ;;  %v1322_v33 = vrot.slane %v1225_v16, 4  ;;  %v292_v14 = vld [vmem:[%s2730_s9 + $0xb8] sm:$0xff]  ;;  %v295_v15 = vld [vmem:[%s2730_s9 + $0xd0] sm:$0xff]  ;;  %320 = vst.msk [vmem:[#allocation2 + $0x13c] sm:$0xff] %vm196_vm0, %v287_v37 }
  0x50   : > { %v1715_v34 = vmul.f32 %v2789_v48, %v860_v56  ;;  %v1323_v51 = vrot.slane %v1226_v20, 4  ;;  %v1567_v52 = vrot.slane %v1470_v23, 6  ;;  %v982_v50 = vmul.f32 %v2774_v41, %v2902_v8  ;;  %321 = vst.msk [vmem:[#allocation2 + $0x144] sm:$0xff] %vm196_vm0, %v288_v44  ;;  %324 = vst.msk [vmem:[#allocation2 + $0x16c] sm:$0xff] %vm196_vm0, %v291_v43  ;;  %v298_v37 = vld [vmem:[%s2730_s9 + $0xe8] sm:$0xff]  ;;  %v300_v43 = vld [vmem:[%s2730_s9 + $0xf8] sm:$0xff] }
  0x51   : > { %v1568_v53 = vrot.slane %v1471_v24, 6  ;;  %v1079_v16 = vsel %vm1076_vm1, %v1077_v28, %v1078_v31  ;;  %v913_v20 = vmul.f32 %v2772_v40, %v860_v56  ;;  %v1227_v23 = vmul.f32 %v2785_v46, %v2902_v8  ;;  %325 = vst.msk [vmem:[#allocation2 + $0x174] sm:$0xff] %vm196_vm0, %v292_v14  ;;  %328 = vst.msk [vmem:[#allocation2 + $0x19c] sm:$0xff] %vm196_vm0, %v295_v15 }
  0x52   : > { %v1472_v24 = vmul.f32 %v2787_v47, %v2902_v8  ;;  %v1189_v28 = vadd.f32 %v1079_v16, %v912_v19  ;;  %v1324_v56 = vsel %vm1321_vm2, %v1322_v33, %v1323_v51  ;;  %v1080_v1 = vrot.slane %v982_v50, 2  ;;  %329 = vst.msk [vmem:[#allocation2 + $0x1a4] sm:$0xff] %vm196_vm0, %v296_v27  ;;  %330 = vst.msk [vmem:[#allocation2 + $0x1b4] sm:$0xff] %vm196_vm0, %v297_v36  ;;  %v2963_v16 = vld [vmem:[#allocation2 + $0x100] sm:$0xff]  ;;  %v2965_v27 = vld [vmem:[#allocation2 + $0x130] sm:$0xff] }
  0x53   : > { %v1569_v44 = vsel %vm1566_vm3, %v1567_v52, %v1568_v53  ;;  %331 = vst.msk [vmem:[#allocation2 + $0x1bc] sm:$0xff] %vm196_vm0, %v298_v37  ;;  %v1325_v12 = vrot.slane %v1227_v23, 4  ;;  %v684_v9 = vadd.f32 %v636_v63, %v584_v57  ;;  %v736_v15 = vmul.f32 %v2768_v38, %v2921_v25  ;;  %332 = vst.msk [vmem:[#allocation2 + $0x1cc] sm:$0xff] %vm196_vm0, %v299_v62  ;;  %v2969_v62 = vld [vmem:[#allocation2 + $0x160] sm:$0xff] }
  0x54   : > { %v1570_v14 = vrot.slane %v1472_v24, 6  ;;  %333 = vst.msk [vmem:[#allocation2 + $0x1d4] sm:$0xff] %vm196_vm0, %v300_v43  ;;  %v1434_v19 = vadd.f32 %v1324_v56, %v1189_v28  ;;  %v1081_v50 = vsel %vm1076_vm1, %v1078_v31, %v1080_v1  ;;  %v783_v33 = vadd.f32 %v735_v17, %v683_v13  ;;  %4026 = vst [vmem:[#allocation18_spill] sm:$0xff] %v2965_v27 }
  0x55   : > { %v835_v52 = vmul.f32 %v2770_v39, %v2874_v30  ;;  %v1190_v23 = vadd.f32 %v1081_v50, %v913_v20  ;;  %v1326_v57 = vsel %vm1321_vm2, %v1323_v51, %v1325_v12  ;;  %v784_v24 = vadd.f32 %v736_v15, %v684_v9  ;;  %4027 = vst [vmem:[#allocation19_spill] sm:$0xff] %v2969_v62  ;;  %v2996_v50 = vld [vmem:[#allocation2 + $0x190] sm:$0xff]  ;;  %v3052_v30 = vld [vmem:[#allocation2 + $0xb8] sm:$0xff] }
  0x56   : > { %v1571_v63 = vsel %vm1566_vm3, %v1568_v53, %v1570_v14  ;;  %v1679_v36 = vadd.f32 %v1569_v44, %v1434_v19  ;;  %v836_v1 = vmul.f32 %v2770_v39, %v2886_v42  ;;  %v437_v17 = vmul.f32 %v2735_v10, %v2854_v18  ;;  %4028 = vst [vmem:[#allocation20_spill] sm:$0xff] %v2996_v50 }
  0x57   : > { %v883_v13 = vadd.f32 %v835_v52, %v783_v33  ;;  %v1435_v31 = vadd.f32 %v1326_v57, %v1190_v23  ;;  %v1716_v37 = vmul.f32 %v2789_v48, %v2902_v8  ;;  %v537_v12 = vmul.f32 %v2737_v11, %v2963_v16  ;;  %v337_v33 = vld [vmem:[#allocation2 + $0x18] sm:$0xff]  ;;  %v338_v52 = vld [vmem:[#allocation2 + $0x20] sm:$0xff]  ;;  %4037 = vst [vmem:[#allocation29_spill] sm:$0xff] %v3052_v30 }
  0x58   : > { %v637_v9 = vmul.f32 %v2758_v32, %v2965_v27  ;;  %v1747_v51 = vadd.f32 %v1715_v34, %v1679_v36  ;;  %v884_v53 = vadd.f32 %v836_v1, %v784_v24  ;;  %v737_v28 = vmul.f32 %v2768_v38, %v2969_v62 }
  0x59   : > { %v1004_v20 = vmul.f32 %v2774_v41, %v883_v13  ;;  %v1680_v56 = vadd.f32 %v1571_v63, %v1435_v31  ;;  %v1249_v44 = vmul.f32 %v2785_v46, %v883_v13  ;;  %v1494_v43 = vmul.f32 %v2787_v47, %v883_v13 }
  0x5a   : > { %v585_v14 = vadd.f32 %v537_v12, %v437_v17  ;;  %2291 = vmatprep.mubr.msk.f32.mxu0 %vm196_vm0, %v1747_v51  ;;  %v2988_v8 = vmul.f32 %v2774_v41, %v884_v53  ;;  %v2991_v34 = vmul.f32 %v2785_v46, %v884_v53  ;;  %v2994_v19 = vmul.f32 %v2787_v47, %v884_v53  ;;  %v3002_v12 = vld [vmem:[#allocation2 + $0x48] sm:$0xff]  ;;  %v3004_v51 = vld [vmem:[#allocation2 + $0x50] sm:$0xff] }
  0x5b   : > { %v1117_v15 = vrot.slane %v1004_v20, 2  ;;  %v1748_v23 = vadd.f32 %v1716_v37, %v1680_v56  ;;  %v928_v57 = vmul.f32 %v2772_v40, %v883_v13  ;;  %v1362_v63 = vrot.slane %v1249_v44, 4  ;;  %4029 = vst [vmem:[#allocation21_spill] sm:$0xff] %v3002_v12  ;;  %4030 = vst [vmem:[#allocation22_spill] sm:$0xff] %v3004_v51  ;;  %v3006_v20 = vld [vmem:[#allocation2 + $0x78] sm:$0xff]  ;;  %v3012_v56 = vld [vmem:[#allocation2 + $0x80] sm:$0xff] }
  0x5c   : > { %v1607_v24 = vrot.slane %v1494_v43, 6  ;;  %v1118_v36 = vrot.slane %v2988_v8, 2  ;;  %v1363_v1 = vrot.slane %v2991_v34, 4  ;;  %v1608_v17 = vrot.slane %v2994_v19, 6  ;;  %4031 = vst [vmem:[#allocation23_spill] sm:$0xff] %v3006_v20  ;;  %4032 = vst [vmem:[#allocation24_spill] sm:$0xff] %v3012_v56 }
  0x5d   : > { %v685_v31 = vadd.f32 %v637_v9, %v585_v14  ;;  %2292 = vmatmul.mubr.msk.f32.vlgmr.msra.gmra.mrb[0].mxu0 %vm196_vm0, %v1748_v23  ;;  %v1731_v37 = vmul.f32 %v2789_v48, %v884_v53  ;;  %v837_v13 = vmul.f32 %v2770_v39, %v2996_v50  ;;  %v3014_v44 = vld [vmem:[#allocation2 + $0xa8] sm:$0xff]  ;;  %v414_v43 = vmul.f32 %v2735_v10, %v337_v33  ;;  %v3021_v23 = vld [vmem:[#allocation2 + $0xb0] sm:$0xff] }
  0x5e   : > { %4033 = vst [vmem:[#allocation25_spill] sm:$0xff] %v3014_v44  ;;  %v415_v9 = vmul.f32 %v2735_v10, %v338_v52  ;;  %v1119_v14 = vsel %vm1076_vm1, %v1117_v15, %v1118_v36  ;;  %v1364_v8 = vsel %vm1321_vm2, %v1362_v63, %v1363_v1  ;;  %v929_v19 = vmul.f32 %v2772_v40, %v884_v53 }
  0x5f   : > { %v785_v34 = vadd.f32 %v737_v28, %v685_v31  ;;  %4034 = vst [vmem:[#allocation26_spill] sm:$0xff] %v3021_v23  ;;  %v1205_v35 = vadd.f32 %v1119_v14, %v928_v57  ;;  %v514_v61 = vmul.f32 %v2737_v11, %v3002_v12  ;;  %v515_v4 = vmul.f32 %v2737_v11, %v3004_v51  ;;  %v3034_v57 = vld [vmem:[#allocation2 + $0xd8] sm:$0xff]  ;;  %v339_v51 = vld [vmem:[#allocation2 + $0x28] sm:$0xff] }
  0x60   : > { %v614_v33 = vmul.f32 %v2758_v32, %v3006_v20  ;;  %v1609_v52 = vsel %vm1566_vm3, %v1607_v24, %v1608_v17  ;;  %v615_v28 = vmul.f32 %v2758_v32, %v3012_v56  ;;  %v714_v53 = vmul.f32 %v2768_v38, %v3014_v44  ;;  %v3049_v12 = vld [vmem:[#allocation2 + $0x88] sm:$0xff] }
  0x61   : > { %v885_v15 = vadd.f32 %v837_v13, %v785_v34  ;;  %v1450_v63 = vadd.f32 %v1364_v8, %v1205_v35  ;;  %v562_v31 = vadd.f32 %v514_v61, %v414_v43  ;;  %v563_v14 = vadd.f32 %v515_v4, %v415_v9  ;;  %v3041_v34 = vld [vmem:[#allocation2 + $0xe0] sm:$0xff]  ;;  %v3045_v35 = vld [vmem:[#allocation2 + $0x58] sm:$0xff]  ;;  %4036 = vst [vmem:[#allocation28_spill] sm:$0xff] %v3049_v12 }
  0x62   : > { %v715_v60 = vmul.f32 %v2768_v38, %v3021_v23  ;;  %v814_v44 = vmul.f32 %v2770_v39, %v3034_v57  ;;  %4035 = vst [vmem:[#allocation27_spill] sm:$0xff] %v3045_v35  ;;  %v815_v43 = vmul.f32 %v2770_v39, %v3041_v34  ;;  %v416_v50 = vmul.f32 %v2735_v10, %v339_v51 }
  0x63   : > { %v1006_v20 = vmul.f32 %v2774_v41, %v885_v15  ;;  %v1251_v24 = vmul.f32 %v2785_v46, %v885_v15  ;;  %v1496_v13 = vmul.f32 %v2787_v47, %v885_v15  ;;  %v1695_v8 = vadd.f32 %v1609_v52, %v1450_v63 }
  0x64   : > { %v662_v61 = vadd.f32 %v614_v33, %v562_v31  ;;  %v663_v4 = vadd.f32 %v615_v28, %v563_v14  ;;  %v516_v52 = vmul.f32 %v2737_v11, %v3045_v35  ;;  %v1732_v63 = vmul.f32 %v2789_v48, %v885_v15 }
  0x65   : > { %v1120_v9 = vrot.slane %v1006_v20, 2  ;;  %v1365_v23 = vrot.slane %v1251_v24, 4  ;;  %v1610_v56 = vrot.slane %v1496_v13, 6  ;;  %v1763_v62 = vadd.f32 %v1731_v37, %v1695_v8  ;;  %v3085_v8 = vld [vmem:[#allocation2 + $0x108] sm:$0xff] }
  0x66   : > { %v762_v27 = vadd.f32 %v714_v53, %v662_v61  ;;  %v763_v42 = vadd.f32 %v715_v60, %v663_v4  ;;  %v3061_v53 = vld [vmem:[#allocation2 + $0xe8] sm:$0xff]  ;;  %v616_v60 = vmul.f32 %v2758_v32, %v3049_v12  ;;  %v564_v14 = vadd.f32 %v516_v52, %v416_v50  ;;  %4039 = vst [vmem:[#allocation31_spill] sm:$0xff] %v3085_v8 }
  0x67   : > { %v1121_v33 = vsel %vm1076_vm1, %v1118_v36, %v1120_v9  ;;  %v1366_v28 = vsel %vm1321_vm2, %v1363_v1, %v1365_v23  ;;  %v1611_v20 = vsel %vm1566_vm3, %v1608_v17, %v1610_v56  ;;  %2315 = vmatprep.mubr.msk.f32.mxu1 %vm196_vm0, %v1763_v62  ;;  %4038 = vst [vmem:[#allocation30_spill] sm:$0xff] %v3061_v53 }
  0x68   : > { %v1206_v31 = vadd.f32 %v1121_v33, %v929_v19  ;;  %v862_v51 = vadd.f32 %v814_v44, %v762_v27  ;;  %v863_v37 = vadd.f32 %v815_v43, %v763_v42  ;;  %v716_v36 = vmul.f32 %v2768_v38, %v3052_v30  ;;  %v3091_v33 = vld [vmem:[#allocation2 + $0x110] sm:$0xff]  ;;  %v3105_v30 = vld [vmem:[#allocation2 + $0x198] sm:$0xff] }
  0x69   : > { %v816_v1 = vmul.f32 %v2770_v39, %v3061_v53  ;;  %v438_v17 = vmul.f32 %v2735_v10, %v3034_v57  ;;  %v439_v61 = vmul.f32 %v2735_v10, %v3041_v34  ;;  %4040 = vst [vmem:[#allocation32_spill] sm:$0xff] %v3091_v33  ;;  %4045 = vst [vmem:[#allocation37_spill] sm:$0xff] %v3105_v30 }
  0x6a   : > { %v1451_v56 = vadd.f32 %v1366_v28, %v1206_v31  ;;  %v914_v62 = vmul.f32 %v2772_v40, %v862_v51  ;;  %v983_v42 = vmul.f32 %v2774_v41, %v862_v51  ;;  %v3074_v27 = vmul.f32 %v2774_v41, %v863_v37  ;;  %v3093_v28 = vld [vmem:[#allocation2 + $0x138] sm:$0xff] }
  0x6b   : > { %v1228_v44 = vmul.f32 %v2785_v46, %v862_v51  ;;  %v3078_v50 = vmul.f32 %v2785_v46, %v863_v37  ;;  %v1473_v19 = vmul.f32 %v2787_v47, %v862_v51  ;;  %v3082_v23 = vmul.f32 %v2787_v47, %v863_v37  ;;  %4041 = vst [vmem:[#allocation33_spill] sm:$0xff] %v3093_v28 }
  0x6c   : > { %v1696_v15 = vadd.f32 %v1611_v20, %v1451_v56  ;;  %v1082_v24 = vrot.slane %v983_v42, 2  ;;  %v1083_v13 = vrot.slane %v3074_v27, 2  ;;  %v1717_v51 = vmul.f32 %v2789_v48, %v863_v37  ;;  %v3097_v42 = vld [vmem:[#allocation2 + $0x140] sm:$0xff]  ;;  %v3099_v27 = vld [vmem:[#allocation2 + $0x168] sm:$0xff] }
  0x6d   : > { %v1327_v4 = vrot.slane %v1228_v44, 4  ;;  %v1328_v43 = vrot.slane %v3078_v50, 4  ;;  %v1572_v9 = vrot.slane %v1473_v19, 6  ;;  %v1573_v52 = vrot.slane %v3082_v23, 6  ;;  %4042 = vst [vmem:[#allocation34_spill] sm:$0xff] %v3097_v42  ;;  %4043 = vst [vmem:[#allocation35_spill] sm:$0xff] %v3099_v27 }
  0x6e   : > { %v1764_v31 = vadd.f32 %v1732_v63, %v1696_v15  ;;  %v1084_v20 = vsel %vm1076_vm1, %v1082_v24, %v1083_v13  ;;  %v664_v56 = vadd.f32 %v616_v60, %v564_v14  ;;  %v915_v19 = vmul.f32 %v2772_v40, %v863_v37  ;;  %v3103_v23 = vld [vmem:[#allocation2 + $0x170] sm:$0xff]  ;;  %v3115_v24 = vld [vmem:[#allocation2 + $0x118] sm:$0xff] }
  0x6f   : > { %v1191_v44 = vadd.f32 %v1084_v20, %v914_v62  ;;  %v1329_v50 = vsel %vm1321_vm2, %v1327_v4, %v1328_v43  ;;  %4044 = vst [vmem:[#allocation36_spill] sm:$0xff] %v3103_v23  ;;  %v538_v63 = vmul.f32 %v2737_v11, %v3085_v8  ;;  %v1574_v60 = vsel %vm1566_vm3, %v1572_v9, %v1573_v52  ;;  %v3117_v4 = vld [vmem:[#allocation2 + $0x1a0] sm:$0xff] }
  0x70   : > { %2316 = vmatmul.mubr.msk.f32.vlgmr.msra.gmra.mrb[0].mxu1 %vm196_vm0, %v1764_v31  ;;  %v764_v14 = vadd.f32 %v716_v36, %v664_v56  ;;  %v539_v15 = vmul.f32 %v2737_v11, %v3091_v33  ;;  %v638_v62 = vmul.f32 %v2758_v32, %v3093_v28  ;;  %4046 = vst [vmem:[#allocation38_spill] sm:$0xff] %v3115_v24  ;;  %4047 = vst [vmem:[#allocation39_spill] sm:$0xff] %v3117_v4 }
  0x71   : > { %v1436_v37 = vadd.f32 %v1329_v50, %v1191_v44  ;;  %v586_v20 = vadd.f32 %v538_v63, %v438_v17  ;;  %v639_v12 = vmul.f32 %v2758_v32, %v3097_v42  ;;  %v738_v31 = vmul.f32 %v2768_v38, %v3099_v27  ;;  %v3127_v44 = vld [vmem:[#allocation2 + $0x148] sm:$0xff] }
  0x72   : > { %v864_v9 = vadd.f32 %v816_v1, %v764_v14  ;;  %v587_v36 = vadd.f32 %v539_v15, %v439_v61  ;;  %v739_v56 = vmul.f32 %v2768_v38, %v3103_v23  ;;  %v838_v28 = vmul.f32 %v2770_v39, %v3105_v30  ;;  %v3138_v15 = vld [vmem:[#allocation2 + $0x178] sm:$0xff] }
  0x73   : > { %v1681_v35 = vadd.f32 %v1574_v60, %v1436_v37  ;;  %v686_v33 = vadd.f32 %v638_v62, %v586_v20  ;;  %v440_v17 = vmul.f32 %v2735_v10, %v3061_v53  ;;  %v540_v50 = vmul.f32 %v2737_v11, %v3115_v24  ;;  %v3140_v20 = vld [vmem:[#allocation2 + $0x1a8] sm:$0xff] }
  0x74   : > { %v985_v63 = vmul.f32 %v2774_v41, %v864_v9  ;;  %v1230_v1 = vmul.f32 %v2785_v46, %v864_v9  ;;  %v1475_v61 = vmul.f32 %v2787_v47, %v864_v9  ;;  %v839_v14 = vmul.f32 %v2770_v39, %v3117_v4 }
  0x75   : > { %v1749_v60 = vadd.f32 %v1717_v51, %v1681_v35  ;;  %v687_v62 = vadd.f32 %v639_v12, %v587_v36  ;;  %v786_v37 = vadd.f32 %v738_v31, %v686_v33  ;;  %v588_v30 = vadd.f32 %v540_v50, %v440_v17 }
  0x76   : > { %v1085_v23 = vrot.slane %v985_v63, 2  ;;  %v1330_v27 = vrot.slane %v1230_v1, 4  ;;  %v1575_v42 = vrot.slane %v1475_v61, 6  ;;  %v640_v24 = vmul.f32 %v2758_v32, %v3127_v44 }
  0x77   : > { %2294 = vmatprep.mubr.msk.f32.mxu0 %vm196_vm0, %v1749_v60  ;;  %v1718_v53 = vmul.f32 %v2789_v48, %v864_v9  ;;  %v787_v8 = vadd.f32 %v739_v56, %v687_v62  ;;  %v886_v4 = vadd.f32 %v838_v28, %v786_v37  ;;  %v740_v35 = vmul.f32 %v2768_v38, %v3138_v15 }
  0x78   : > { %v1086_v12 = vsel %vm1076_vm1, %v1083_v13, %v1085_v23  ;;  %v1331_v33 = vsel %vm1321_vm2, %v1328_v43, %v1330_v27  ;;  %v688_v51 = vadd.f32 %v640_v24, %v588_v30  ;;  %v840_v31 = vmul.f32 %v2770_v39, %v3140_v20 }
  0x79   : > { %v1192_v36 = vadd.f32 %v1086_v12, %v915_v19  ;;  %v1576_v17 = vsel %vm1566_vm3, %v1573_v52, %v1575_v42  ;;  %v887_v50 = vadd.f32 %v839_v14, %v787_v8  ;;  %v1007_v63 = vmul.f32 %v2774_v41, %v886_v4 }
  0x7a   : > { %v930_v9 = vmul.f32 %v2772_v40, %v886_v4  ;;  %v1252_v28 = vmul.f32 %v2785_v46, %v886_v4  ;;  %v1497_v56 = vmul.f32 %v2787_v47, %v886_v4  ;;  %v788_v1 = vadd.f32 %v740_v35, %v688_v51 }
  0x7b   : > { %v1437_v13 = vadd.f32 %v1331_v33, %v1192_v36  ;;  %v1008_v43 = vmul.f32 %v2774_v41, %v887_v50  ;;  %v1122_v30 = vrot.slane %v1007_v63, 2  ;;  %v1253_v27 = vmul.f32 %v2785_v46, %v887_v50 }
  0x7c   : > { %v1367_v23 = vrot.slane %v1252_v28, 4  ;;  %v1498_v19 = vmul.f32 %v2787_v47, %v887_v50  ;;  %v1612_v52 = vrot.slane %v1497_v56, 6  ;;  %v565_v8 = vadd.f32 %v2827_v2, %v2783_v45 }
  0x7d   : > { %v1682_v42 = vadd.f32 %v1576_v17, %v1437_v13  ;;  %v1123_v24 = vrot.slane %v1008_v43, 2  ;;  %v1368_v61 = vrot.slane %v1253_v27, 4  ;;  %v888_v14 = vadd.f32 %v840_v31, %v788_v1 }
  0x7e   : > { %v1613_v60 = vrot.slane %v1498_v19, 6  ;;  %v1733_v4 = vmul.f32 %v2789_v48, %v887_v50  ;;  %v566_v62 = vadd.f32 %v2830_v3, %v2800_v55  ;;  %v617_v37 = vmul.f32 %v2758_v32, %v2797_v54 }
  0x7f   : > { %v1750_v35 = vadd.f32 %v1718_v53, %v1682_v42  ;;  %v1124_v12 = vsel %vm1076_vm1, %v1122_v30, %v1123_v24  ;;  %v1369_v33 = vsel %vm1321_vm2, %v1367_v23, %v1368_v61  ;;  %v1009_v45 = vmul.f32 %v2774_v41, %v888_v14 }
  0x80   : > { %v1207_v2 = vadd.f32 %v1124_v12, %v930_v9  ;;  %v931_v51 = vmul.f32 %v2772_v40, %v887_v50  ;;  %v1254_v31 = vmul.f32 %v2785_v46, %v888_v14  ;;  %v1499_v36 = vmul.f32 %v2787_v47, %v888_v14 }
  0x81   : > { %2295 = vmatmul.mubr.msk.f32.gmra.mrb[2].mxu0 %vm196_vm0, %v1750_v35  ;;  %v1614_v55 = vsel %vm1566_vm3, %v1612_v52, %v1613_v60  ;;  %v1125_v3 = vrot.slane %v1009_v45, 2  ;;  %v618_v54 = vmul.f32 %v2758_v32, %v2808_v59  ;;  %v665_v53 = vadd.f32 %v617_v37, %v565_v8 }
  0x82   : > { %v1452_v17 = vadd.f32 %v1369_v33, %v1207_v2  ;;  %v1370_v63 = vrot.slane %v1254_v31, 4  ;;  %v1615_v28 = vrot.slane %v1499_v36, 6  ;;  %v717_v9 = vmul.f32 %v2768_v38, %v2820_v0 }
  0x83   : > { %v1126_v50 = vsel %vm1076_vm1, %v1123_v24, %v1125_v3  ;;  %v666_v56 = vadd.f32 %v618_v54, %v566_v62  ;;  %v718_v1 = vmul.f32 %v2768_v38, %v2840_v7  ;;  %v817_v13 = vmul.f32 %v2770_v39, %v2860_v21 }
  0x84   : > { %v1697_v43 = vadd.f32 %v1614_v55, %v1452_v17  ;;  %v1208_v30 = vadd.f32 %v1126_v50, %v931_v51  ;;  %v1371_v59 = vsel %vm1321_vm2, %v1368_v61, %v1370_v63  ;;  %v1616_v27 = vsel %vm1566_vm3, %v1613_v60, %v1615_v28  ;;  %v3215_v28 = vld [vmem:[#allocation2 + $0x1b0] sm:$0xff] }
  0x85   : > { %v765_v23 = vadd.f32 %v717_v9, %v665_v53  ;;  %v766_v19 = vadd.f32 %v718_v1, %v666_v56  ;;  %v818_v0 = vmul.f32 %v2770_v39, %v2862_v22  ;;  %v519_v52 = vmul.f32 %v2737_v11, %v2836_v5 }
  0x86   : > { %v1765_v8 = vadd.f32 %v1733_v4, %v1697_v43  ;;  %v1453_v42 = vadd.f32 %v1371_v59, %v1208_v30  ;;  %v1734_v7 = vmul.f32 %v2789_v48, %v888_v14  ;;  %v619_v24 = vmul.f32 %v2758_v32, %v2838_v6  ;;  %v3221_v43 = vld [vmem:[#allocation2 + $0x1b8] sm:$0xff] }
  0x87   : > { %v865_v62 = vadd.f32 %v817_v13, %v765_v23  ;;  %v866_v37 = vadd.f32 %v818_v0, %v766_v19  ;;  %v567_v61 = vadd.f32 %v519_v52, %v2806_v58  ;;  %v719_v60 = vmul.f32 %v2768_v38, %v2854_v18  ;;  %v4048_v23 = vld [vmem:[#allocation11_spill] sm:$0xff]  ;;  %v4049_v52 = vld [vmem:[#allocation13_spill] sm:$0xff] }
  0x88   : > { %2318 = vmatprep.mubr.msk.f32.mxu1 %vm196_vm0, %v1765_v8  ;;  %v1698_v35 = vadd.f32 %v1616_v27, %v1453_v42  ;;  %v819_v5 = vmul.f32 %v2770_v39, %v2963_v16  ;;  %v441_v4 = vmul.f32 %v2735_v10, %v2860_v21  ;;  %v541_v14 = vmul.f32 %v2737_v11, %v2868_v26 }
  0x89   : > { %v916_v6 = vmul.f32 %v2772_v40, %v865_v62  ;;  %v986_v12 = vmul.f32 %v2774_v41, %v865_v62  ;;  %v987_v58 = vmul.f32 %v2774_v41, %v866_v37  ;;  %v1231_v18 = vmul.f32 %v2785_v46, %v865_v62 }
  0x8a   : > { %v1766_v33 = vadd.f32 %v1734_v7, %v1698_v35  ;;  %v1232_v45 = vmul.f32 %v2785_v46, %v866_v37  ;;  %v1476_v2 = vmul.f32 %v2787_v47, %v865_v62  ;;  %v1477_v51 = vmul.f32 %v2787_v47, %v866_v37 }
  0x8b   : > { %v1087_v31 = vrot.slane %v986_v12, 2  ;;  %v1088_v21 = vrot.slane %v987_v58, 2  ;;  %v1332_v36 = vrot.slane %v1231_v18, 4  ;;  %v442_v26 = vmul.f32 %v2735_v10, %v2862_v22 }
  0x8c   : > { %2319 = vmatmul.mubr.msk.f32.gmra.mrb[2].mxu1 %vm196_vm0, %v1766_v33  ;;  %v1333_v55 = vrot.slane %v1232_v45, 4  ;;  %v1577_v3 = vrot.slane %v1476_v2, 6  ;;  %v1578_v54 = vrot.slane %v1477_v51, 6  ;;  %v667_v53 = vadd.f32 %v619_v24, %v567_v61 }
  0x8d   : > { %v1089_v17 = vsel %vm1076_vm1, %v1087_v31, %v1088_v21  ;;  %v1719_v63 = vmul.f32 %v2789_v48, %v866_v37  ;;  %v542_v9 = vmul.f32 %v2737_v11, %v2872_v29  ;;  %v589_v50 = vadd.f32 %v541_v14, %v441_v4 }
  0x8e   : > { %v1193_v56 = vadd.f32 %v1089_v17, %v916_v6  ;;  %v1334_v1 = vsel %vm1321_vm2, %v1332_v36, %v1333_v55  ;;  %v1579_v22 = vsel %vm1566_vm3, %v1577_v3, %v1578_v54  ;;  %v767_v13 = vadd.f32 %v719_v60, %v667_v53  ;;  %v4050_v6 = vld [vmem:[#allocation18_spill] sm:$0xff]  ;;  %v4051_v53 = vld [vmem:[#allocation19_spill] sm:$0xff] }
  0x8f   : > { %v590_v30 = vadd.f32 %v542_v9, %v442_v26  ;;  %v641_v59 = vmul.f32 %v2758_v32, %v2892_v49  ;;  %v642_v27 = vmul.f32 %v2758_v32, %v2921_v25  ;;  %v741_v19 = vmul.f32 %v2768_v38, %v4048_v23 }
  0x90   : > { %v1438_v29 = vadd.f32 %v1334_v1, %v1193_v56  ;;  %v867_v0 = vadd.f32 %v819_v5, %v767_v13  ;;  %v742_v8 = vmul.f32 %v2768_v38, %v4049_v52  ;;  %v841_v42 = vmul.f32 %v2770_v39, %v3215_v28  ;;  %v3257_v13 = vld [vmem:[#allocation2 + $0x1c0] sm:$0xff] }
  0x91   : > { %v689_v7 = vadd.f32 %v641_v59, %v589_v50  ;;  %v690_v24 = vadd.f32 %v642_v27, %v590_v30  ;;  %v842_v62 = vmul.f32 %v2770_v39, %v3221_v43  ;;  %v443_v49 = vmul.f32 %v2735_v10, %v2963_v16  ;;  %v4052_v27 = vld [vmem:[#allocation20_spill] sm:$0xff] }
  0x92   : > { %v1683_v25 = vadd.f32 %v1579_v22, %v1438_v29  ;;  %v988_v61 = vmul.f32 %v2774_v41, %v867_v0  ;;  %v1233_v60 = vmul.f32 %v2785_v46, %v867_v0  ;;  %v1478_v35 = vmul.f32 %v2787_v47, %v867_v0 }
  0x93   : > { %v917_v5 = vmul.f32 %v2772_v40, %v866_v37  ;;  %v789_v4 = vadd.f32 %v741_v19, %v689_v7  ;;  %v790_v14 = vadd.f32 %v742_v8, %v690_v24  ;;  %v543_v12 = vmul.f32 %v2737_v11, %v4050_v6 }
  0x94   : > { %v1751_v58 = vadd.f32 %v1719_v63, %v1683_v25  ;;  %v1090_v18 = vrot.slane %v988_v61, 2  ;;  %v1335_v33 = vrot.slane %v1233_v60, 4  ;;  %v1580_v45 = vrot.slane %v1478_v35, 6 }
  0x95   : > { %v1720_v2 = vmul.f32 %v2789_v48, %v867_v0  ;;  %v889_v51 = vadd.f32 %v841_v42, %v789_v4  ;;  %v890_v31 = vadd.f32 %v842_v62, %v790_v14  ;;  %v591_v36 = vadd.f32 %v543_v12, %v443_v49  ;;  %v4054_v14 = vld [vmem:[#allocation22_spill] sm:$0xff] }
  0x96   : > { %2297 = vmatprep.mubr.msk.f32.mxu0 %vm196_vm0, %v1751_v58  ;;  %v1091_v26 = vsel %vm1076_vm1, %v1088_v21, %v1090_v18  ;;  %v1336_v37 = vsel %vm1321_vm2, %v1333_v55, %v1335_v33  ;;  %v1581_v3 = vsel %vm1566_vm3, %v1578_v54, %v1580_v45  ;;  %v643_v17 = vmul.f32 %v2758_v32, %v4051_v53  ;;  %v4055_v18 = vld [vmem:[#allocation23_spill] sm:$0xff]  ;;  %v4056_v45 = vld [vmem:[#allocation24_spill] sm:$0xff] }
  0x97   : > { %v1194_v63 = vadd.f32 %v1091_v26, %v917_v5  ;;  %v932_v9 = vmul.f32 %v2772_v40, %v889_v51  ;;  %v1010_v50 = vmul.f32 %v2774_v41, %v889_v51  ;;  %v1011_v56 = vmul.f32 %v2774_v41, %v890_v31  ;;  %v4053_v5 = vld [vmem:[#allocation21_spill] sm:$0xff] }
  0x98   : > { %v1255_v1 = vmul.f32 %v2785_v46, %v889_v51  ;;  %v1256_v22 = vmul.f32 %v2785_v46, %v890_v31  ;;  %v1500_v21 = vmul.f32 %v2787_v47, %v889_v51  ;;  %v1501_v55 = vmul.f32 %v2787_v47, %v890_v31 }
  0x99   : > { %v1439_v54 = vadd.f32 %v1336_v37, %v1194_v63  ;;  %v1127_v30 = vrot.slane %v1010_v50, 2  ;;  %v1128_v59 = vrot.slane %v1011_v56, 2  ;;  %v743_v23 = vmul.f32 %v2768_v38, %v4052_v27 }
  0x9a   : > { %v1372_v19 = vrot.slane %v1255_v1, 4  ;;  %v1373_v29 = vrot.slane %v1256_v22, 4  ;;  %v1617_v0 = vrot.slane %v1500_v21, 6  ;;  %v1618_v52 = vrot.slane %v1501_v55, 6  ;;  %v4059_v55 = vld [vmem:[#allocation31_spill] sm:$0xff] }
  0x9b   : > { %v1684_v8 = vadd.f32 %v1581_v3, %v1439_v54  ;;  %v1129_v42 = vsel %vm1076_vm1, %v1127_v30, %v1128_v59  ;;  %v691_v7 = vadd.f32 %v643_v17, %v591_v36  ;;  %v843_v24 = vmul.f32 %v2770_v39, %v3257_v13  ;;  %v4057_v36 = vld [vmem:[#allocation25_spill] sm:$0xff]  ;;  %v4058_v3 = vld [vmem:[#allocation26_spill] sm:$0xff] }
  0x9c   : > { %v1209_v62 = vadd.f32 %v1129_v42, %v932_v9  ;;  %v1374_v49 = vsel %vm1321_vm2, %v1372_v19, %v1373_v29  ;;  %v1619_v25 = vsel %vm1566_vm3, %v1617_v0, %v1618_v52  ;;  %v1735_v61 = vmul.f32 %v2789_v48, %v890_v31 }
  0x9d   : > { %v1752_v60 = vadd.f32 %v1720_v2, %v1684_v8  ;;  %v791_v35 = vadd.f32 %v743_v23, %v691_v7  ;;  %v420_v4 = vmul.f32 %v2735_v10, %v4053_v5  ;;  %v421_v12 = vmul.f32 %v2735_v10, %v4054_v14  ;;  %v4060_v23 = vld [vmem:[#allocation32_spill] sm:$0xff]  ;;  %v4061_v7 = vld [vmem:[#allocation27_spill] sm:$0xff] }
  0x9e   : > { %v1454_v58 = vadd.f32 %v1374_v49, %v1209_v62  ;;  %v520_v33 = vmul.f32 %v2737_v11, %v4055_v18  ;;  %v521_v51 = vmul.f32 %v2737_v11, %v4056_v45  ;;  %v620_v26 = vmul.f32 %v2758_v32, %v4057_v36  ;;  %v4065_v36 = vld [vmem:[#allocation38_spill] sm:$0xff] }
  0x9f   : > { %2298 = vmatmul.mubr.msk.f32.gmra.mrb[4].mxu0 %vm196_vm0, %v1752_v60  ;;  %v891_v2 = vadd.f32 %v843_v24, %v791_v35  ;;  %v933_v37 = vmul.f32 %v2772_v40, %v890_v31  ;;  %v621_v53 = vmul.f32 %v2758_v32, %v4058_v3  ;;  %v720_v17 = vmul.f32 %v2768_v38, %v3034_v57 }
  0xa0   : > { %v1699_v63 = vadd.f32 %v1619_v25, %v1454_v58  ;;  %v568_v9 = vadd.f32 %v520_v33, %v420_v4  ;;  %v569_v50 = vadd.f32 %v521_v51, %v421_v12  ;;  %v721_v56 = vmul.f32 %v2768_v38, %v3041_v34  ;;  %v4062_v25 = vld [vmem:[#allocation28_spill] sm:$0xff]  ;;  %v4063_v4 = vld [vmem:[#allocation29_spill] sm:$0xff]  ;;  %v4064_v33 = vld [vmem:[#allocation30_spill] sm:$0xff] }
  0xa1   : > { %v1012_v1 = vmul.f32 %v2774_v41, %v891_v2  ;;  %v1257_v22 = vmul.f32 %v2785_v46, %v891_v2  ;;  %v1502_v21 = vmul.f32 %v2787_v47, %v891_v2  ;;  %v820_v31 = vmul.f32 %v2770_v39, %v4059_v55 }
  0xa2   : > { %v1767_v54 = vadd.f32 %v1735_v61, %v1699_v63  ;;  %v668_v30 = vadd.f32 %v620_v26, %v568_v9  ;;  %v669_v27 = vadd.f32 %v621_v53, %v569_v50  ;;  %v821_v19 = vmul.f32 %v2770_v39, %v4060_v23 }
  0xa3   : > { %v1130_v0 = vrot.slane %v1012_v1, 2  ;;  %v1375_v8 = vrot.slane %v1257_v22, 4  ;;  %v1620_v42 = vrot.slane %v1502_v21, 6  ;;  %v422_v34 = vmul.f32 %v2735_v10, %v4061_v7  ;;  %v4066_v22 = vld [vmem:[#allocation33_spill] sm:$0xff] }
  0xa4   : > { %2321 = vmatprep.mubr.msk.f32.mxu1 %vm196_vm0, %v1767_v54  ;;  %v1736_v24 = vmul.f32 %v2789_v48, %v891_v2  ;;  %v768_v62 = vadd.f32 %v720_v17, %v668_v30  ;;  %v769_v49 = vadd.f32 %v721_v56, %v669_v27  ;;  %v522_v61 = vmul.f32 %v2737_v11, %v4062_v25  ;;  %v3326_v25 = vld [vmem:[#allocation2 + $0x1d0] sm:$0xff] }
  0xa5   : > { %v1131_v60 = vsel %vm1076_vm1, %v1128_v59, %v1130_v0  ;;  %v1376_v35 = vsel %vm1321_vm2, %v1373_v29, %v1375_v8  ;;  %v1621_v5 = vsel %vm1566_vm3, %v1618_v52, %v1620_v42  ;;  %v622_v14 = vmul.f32 %v2758_v32, %v4063_v4 }
  0xa6   : > { %v1210_v12 = vadd.f32 %v1131_v60, %v933_v37  ;;  %v868_v58 = vadd.f32 %v820_v31, %v768_v62  ;;  %v869_v18 = vadd.f32 %v821_v19, %v769_v49  ;;  %v722_v45 = vmul.f32 %v2768_v38, %v4064_v33  ;;  %v3324_v49 = vld [vmem:[#allocation2 + $0x1c8] sm:$0xff] }
  0xa7   : > { %v570_v51 = vadd.f32 %v522_v61, %v422_v34  ;;  %v822_v26 = vmul.f32 %v2770_v39, %v4065_v36  ;;  %v444_v59 = vmul.f32 %v2735_v10, %v4059_v55  ;;  %v445_v29 = vmul.f32 %v2735_v10, %v4060_v23  ;;  %v4067_v61 = vld [vmem:[#allocation34_spill] sm:$0xff] }
  0xa8   : > { %v1455_v52 = vadd.f32 %v1376_v35, %v1210_v12  ;;  %v918_v2 = vmul.f32 %v2772_v40, %v868_v58  ;;  %v989_v37 = vmul.f32 %v2774_v41, %v868_v58  ;;  %v990_v3 = vmul.f32 %v2774_v41, %v869_v18 }
  0xa9   : > { %v1234_v53 = vmul.f32 %v2785_v46, %v868_v58  ;;  %v1235_v17 = vmul.f32 %v2785_v46, %v869_v18  ;;  %v1479_v63 = vmul.f32 %v2787_v47, %v868_v58  ;;  %v1480_v9 = vmul.f32 %v2787_v47, %v869_v18 }
  0xaa   : > { %v1700_v50 = vadd.f32 %v1621_v5, %v1455_v52  ;;  %v1092_v56 = vrot.slane %v989_v37, 2  ;;  %v1093_v1 = vrot.slane %v990_v3, 2  ;;  %v544_v21 = vmul.f32 %v2737_v11, %v4066_v22  ;;  %v4068_v5 = vld [vmem:[#allocation35_spill] sm:$0xff] }
  0xab   : > { %v1337_v31 = vrot.slane %v1234_v53, 4  ;;  %v1338_v54 = vrot.slane %v1235_v17, 4  ;;  %v1582_v30 = vrot.slane %v1479_v63, 6  ;;  %v1583_v27 = vrot.slane %v1480_v9, 6 }
  0xac   : > { %v1768_v19 = vadd.f32 %v1736_v24, %v1700_v50  ;;  %v1094_v0 = vsel %vm1076_vm1, %v1092_v56, %v1093_v1  ;;  %v1721_v8 = vmul.f32 %v2789_v48, %v869_v18  ;;  %v670_v42 = vadd.f32 %v622_v14, %v570_v51  ;;  %v4069_v14 = vld [vmem:[#allocation36_spill] sm:$0xff]  ;;  %v4070_v51 = vld [vmem:[#allocation37_spill] sm:$0xff] }
  0xad   : > { %v1195_v7 = vadd.f32 %v1094_v0, %v918_v2  ;;  %v1339_v34 = vsel %vm1321_vm2, %v1337_v31, %v1338_v54  ;;  %v1584_v62 = vsel %vm1566_vm3, %v1582_v30, %v1583_v27  ;;  %v545_v60 = vmul.f32 %v2737_v11, %v4067_v61  ;;  %v4071_v2 = vld [vmem:[#allocation39_spill] sm:$0xff] }
  0xae   : > { %2322 = vmatmul.mubr.msk.f32.gmra.mrb[4].mxu1 %vm196_vm0, %v1768_v19  ;;  %v770_v24 = vadd.f32 %v722_v45, %v670_v42  ;;  %v592_v35 = vadd.f32 %v544_v21, %v444_v59  ;;  %v644_v4 = vmul.f32 %v2758_v32, %v4068_v5  ;;  %v645_v12 = vmul.f32 %v2758_v32, %v4069_v14  ;;  %v3360_v14 = vld [vmem:[#allocation2 + $0x1d8] sm:$0xff] }
  0xaf   : > { %v1440_v58 = vadd.f32 %v1339_v34, %v1195_v7  ;;  %v593_v33 = vadd.f32 %v545_v60, %v445_v29  ;;  %v744_v52 = vmul.f32 %v2768_v38, %v4070_v51  ;;  %v745_v37 = vmul.f32 %v2768_v38, %v4071_v2 }
  0xb0   : > { %v870_v3 = vadd.f32 %v822_v26, %v770_v24  ;;  %v692_v53 = vadd.f32 %v644_v4, %v592_v35  ;;  %v844_v45 = vmul.f32 %v2770_v39, %v3324_v49  ;;  %v845_v59 = vmul.f32 %v2770_v39, %v3326_v25 }
  0xb1   : > { %v1685_v17 = vadd.f32 %v1584_v62, %v1440_v58  ;;  %v693_v63 = vadd.f32 %v645_v12, %v593_v33  ;;  %v446_v9 = vmul.f32 %v2735_v10, %v4065_v36  ;;  %v546_v29 = vmul.f32 %v2737_v11, %v3127_v44 }
  0xb2   : > { %v919_v50 = vmul.f32 %v2772_v40, %v869_v18  ;;  %v991_v56 = vmul.f32 %v2774_v41, %v870_v3  ;;  %v1236_v26 = vmul.f32 %v2785_v46, %v870_v3  ;;  %v1481_v21 = vmul.f32 %v2787_v47, %v870_v3 }
  0xb3   : > { %v1753_v31 = vadd.f32 %v1721_v8, %v1685_v17  ;;  %v792_v30 = vadd.f32 %v744_v52, %v692_v53  ;;  %v793_v19 = vadd.f32 %v745_v37, %v693_v63  ;;  %v594_v0 = vadd.f32 %v546_v29, %v446_v9 }
  0xb4   : > { %v1095_v42 = vrot.slane %v991_v56, 2  ;;  %v1340_v7 = vrot.slane %v1236_v26, 4  ;;  %v1585_v34 = vrot.slane %v1481_v21, 6  ;;  %v646_v62 = vmul.f32 %v2758_v32, %v3138_v15 }
  0xb5   : > { %2300 = vmatprep.mubr.msk.f32.mxu0 %vm196_vm0, %v1753_v31  ;;  %v1722_v18 = vmul.f32 %v2789_v48, %v870_v3  ;;  %v892_v60 = vadd.f32 %v844_v45, %v792_v30  ;;  %v893_v24 = vadd.f32 %v845_v59, %v793_v19  ;;  %v746_v35 = vmul.f32 %v2768_v38, %v3140_v20  ;;  %v4072_v31 = vld [vmem:[#allocation6_spill] sm:$0xff] }
  0xb6   : > { %v1096_v8 = vsel %vm1076_vm1, %v1093_v1, %v1095_v42  ;;  %v1341_v5 = vsel %vm1321_vm2, %v1338_v54, %v1340_v7  ;;  %v1586_v4 = vsel %vm1566_vm3, %v1583_v27, %v1585_v34  ;;  %v694_v12 = vadd.f32 %v646_v62, %v594_v0  ;;  %v4073_v30 = vld [vmem:[#allocation10_spill] sm:$0xff]  ;;  %v4074_v7 = vld [vmem:[#allocation7_spill] sm:$0xff]  ;;  %v4075_v34 = vld [vmem:[#allocation12_spill] sm:$0xff] }
  0xb7   : > { %v1196_v58 = vadd.f32 %v1096_v8, %v919_v50  ;;  %v934_v15 = vmul.f32 %v2772_v40, %v892_v60  ;;  %v1013_v33 = vmul.f32 %v2774_v41, %v892_v60  ;;  %v1014_v51 = vmul.f32 %v2774_v41, %v893_v24 }
  0xb8   : > { %v1258_v52 = vmul.f32 %v2785_v46, %v892_v60  ;;  %v1259_v20 = vmul.f32 %v2785_v46, %v893_v24  ;;  %v1503_v1 = vmul.f32 %v2787_v47, %v892_v60  ;;  %v1504_v54 = vmul.f32 %v2787_v47, %v893_v24  ;;  %v3379_v60 = vld [vmem:[#allocation2 + $0xc0] sm:$0xff] }
  0xb9   : > { %v1441_v2 = vadd.f32 %v1341_v5, %v1196_v58  ;;  %v1132_v27 = vrot.slane %v1013_v33, 2  ;;  %v1133_v37 = vrot.slane %v1014_v51, 2  ;;  %v846_v3 = vmul.f32 %v2770_v39, %v3360_v14  ;;  %v3391_v58 = vld [vmem:[#allocation2 + $0xf8] sm:$0xff] }
  0xba   : > { %v1377_v53 = vrot.slane %v1258_v52, 4  ;;  %v1378_v45 = vrot.slane %v1259_v20, 4  ;;  %v1622_v59 = vrot.slane %v1503_v1, 6  ;;  %v1623_v17 = vrot.slane %v1504_v54, 6 }
  0xbb   : > { %v1686_v63 = vadd.f32 %v1586_v4, %v1441_v2  ;;  %v1134_v9 = vsel %vm1076_vm1, %v1132_v27, %v1133_v37  ;;  %v1737_v29 = vmul.f32 %v2789_v48, %v893_v24  ;;  %v794_v50 = vadd.f32 %v746_v35, %v694_v12  ;;  %v3383_v35 = vld [vmem:[#allocation2 + $0xc8] sm:$0xff]  ;;  %v3387_v12 = vld [vmem:[#allocation2 + $0xf0] sm:$0xff]  ;;  %v3400_v27 = vld [vmem:[#allocation2 + $0x120] sm:$0xff] }
  0xbc   : > { %v1211_v56 = vadd.f32 %v1134_v9, %v934_v15  ;;  %v1379_v26 = vsel %vm1321_vm2, %v1377_v53, %v1378_v45  ;;  %v1624_v21 = vsel %vm1566_vm3, %v1622_v59, %v1623_v17  ;;  %v571_v19 = vadd.f32 %v4073_v30, %v4072_v31  ;;  %v3404_v9 = vld [vmem:[#allocation2 + $0x128] sm:$0xff]  ;;  %v2389_v31 = vld [vmem:[#allocation2 + $0x70] sm:$0xff] }
  0xbd   : > { %v1754_v0 = vadd.f32 %v1722_v18, %v1686_v63  ;;  %v894_v42 = vadd.f32 %v846_v3, %v794_v50  ;;  %v572_v62 = vadd.f32 %v4075_v34, %v4074_v7  ;;  %v623_v8 = vmul.f32 %v3379_v60, %v2758_v32  ;;  %v3412_v7 = vld [vmem:[#allocation2 + $0xa0] sm:$0xff] }
  0xbe   : > { %v1456_v5 = vadd.f32 %v1379_v26, %v1211_v56  ;;  %v624_v4 = vmul.f32 %v3383_v35, %v2758_v32  ;;  %v723_v18 = vmul.f32 %v3387_v12, %v2768_v38  ;;  %v724_v15 = vmul.f32 %v3391_v58, %v2768_v38  ;;  %4076 = vst [vmem:[#allocation11_spill] sm:$0xff] %v3412_v7 }
  0xbf   : > { %2301 = vmatmul.mubr.msk.f32.gmra.mrb[6].mxu0 %vm196_vm0, %v1754_v0  ;;  %v935_v33 = vmul.f32 %v2772_v40, %v893_v24  ;;  %v1015_v51 = vmul.f32 %v2774_v41, %v894_v42  ;;  %v1260_v52 = vmul.f32 %v2785_v46, %v894_v42  ;;  %v1505_v20 = vmul.f32 %v2787_v47, %v894_v42 }
  0xc0   : > { %v1701_v1 = vadd.f32 %v1624_v21, %v1456_v5  ;;  %v671_v54 = vadd.f32 %v623_v8, %v571_v19  ;;  %v672_v2 = vadd.f32 %v624_v4, %v572_v62  ;;  %v823_v3 = vmul.f32 %v3400_v27, %v2770_v39 }
  0xc1   : > { %v1135_v53 = vrot.slane %v1015_v51, 2  ;;  %v1380_v59 = vrot.slane %v1260_v52, 4  ;;  %v1625_v63 = vrot.slane %v1505_v20, 6  ;;  %v824_v24 = vmul.f32 %v3404_v9, %v2770_v39 }
  0xc2   : > { %v1769_v50 = vadd.f32 %v1737_v29, %v1701_v1  ;;  %v771_v56 = vadd.f32 %v723_v18, %v671_v54  ;;  %v772_v26 = vadd.f32 %v724_v15, %v672_v2  ;;  %v425_v21 = vmul.f32 %v2389_v31, %v2735_v10  ;;  %v3418_v18 = vld [vmem:[#allocation2 + $0xd0] sm:$0xff] }
  0xc3   : > { %v1136_v30 = vsel %vm1076_vm1, %v1133_v37, %v1135_v53  ;;  %v1381_v19 = vsel %vm1321_vm2, %v1378_v45, %v1380_v59  ;;  %v1738_v0 = vmul.f32 %v2789_v48, %v894_v42  ;;  %v525_v34 = vmul.f32 %v3412_v7, %v2737_v11  ;;  %4077 = vst [vmem:[#allocation13_spill] sm:$0xff] %v3418_v18 }
  0xc4   : > { %2324 = vmatprep.mubr.msk.f32.mxu1 %vm196_vm0, %v1769_v50  ;;  %v1212_v62 = vadd.f32 %v1136_v30, %v935_v33  ;;  %v1626_v29 = vsel %vm1566_vm3, %v1623_v17, %v1625_v63  ;;  %v871_v8 = vadd.f32 %v823_v3, %v771_v56  ;;  %v872_v5 = vadd.f32 %v824_v24, %v772_v26 }
  0xc5   : > { %v573_v4 = vadd.f32 %v525_v34, %v425_v21  ;;  %v625_v37 = vmul.f32 %v3418_v18, %v2758_v32  ;;  %v725_v45 = vmul.f32 %v2768_v38, %v2963_v16  ;;  %v825_v42 = vmul.f32 %v2770_v39, %v4050_v6  ;;  %v3446_v21 = vld [vmem:[#allocation2 + $0x1e0] sm:$0xff] }
  0xc6   : > { %v1457_v15 = vadd.f32 %v1381_v19, %v1212_v62  ;;  %v920_v51 = vmul.f32 %v2772_v40, %v871_v8  ;;  %v992_v33 = vmul.f32 %v2774_v41, %v871_v8  ;;  %v3429_v17 = vmul.f32 %v2774_v41, %v872_v5  ;;  %4078 = vst [vmem:[#allocation18_spill] sm:$0xff] %v3446_v21 }
  0xc7   : > { %v1237_v52 = vmul.f32 %v2785_v46, %v871_v8  ;;  %v3433_v20 = vmul.f32 %v2785_v46, %v872_v5  ;;  %v1482_v1 = vmul.f32 %v2787_v47, %v871_v8  ;;  %v3437_v16 = vmul.f32 %v2787_v47, %v872_v5  ;;  %v3454_v8 = vld [vmem:[#allocation2 + $0x1e8] sm:$0xff] }
  0xc8   : > { %v1702_v54 = vadd.f32 %v1626_v29, %v1457_v15  ;;  %v1097_v6 = vrot.slane %v992_v33, 2  ;;  %v1098_v2 = vrot.slane %v3429_v17, 2  ;;  %v447_v3 = vmul.f32 %v3400_v27, %v2735_v10  ;;  %4079 = vst [vmem:[#allocation19_spill] sm:$0xff] %v3454_v8  ;;  %v3456_v15 = vld [vmem:[#allocation2 + $0x150] sm:$0xff] }
  0xc9   : > { %v1342_v53 = vrot.slane %v1237_v52, 4  ;;  %v1343_v59 = vrot.slane %v3433_v20, 4  ;;  %v1587_v63 = vrot.slane %v1482_v1, 6  ;;  %v1588_v24 = vrot.slane %v3437_v16, 6  ;;  %v3470_v16 = vld [vmem:[#allocation2 + $0x130] sm:$0xff] }
  0xca   : > { %v1770_v50 = vadd.f32 %v1738_v0, %v1702_v54  ;;  %v1099_v56 = vsel %vm1076_vm1, %v1097_v6, %v1098_v2  ;;  %v1723_v26 = vmul.f32 %v2789_v48, %v872_v5  ;;  %v673_v31 = vadd.f32 %v625_v37, %v573_v4  ;;  %v3460_v37 = vld [vmem:[#allocation2 + $0x158] sm:$0xff]  ;;  %4080 = vst [vmem:[#allocation20_spill] sm:$0xff] %v3470_v16 }
  0xcb   : > { %v1197_v30 = vadd.f32 %v1099_v56, %v920_v51  ;;  %v1344_v19 = vsel %vm1321_vm2, %v1342_v53, %v1343_v59  ;;  %v1589_v34 = vsel %vm1566_vm3, %v1587_v63, %v1588_v24  ;;  %v448_v62 = vmul.f32 %v3404_v9, %v2735_v10  ;;  %v3476_v63 = vld [vmem:[#allocation2 + $0x160] sm:$0xff] }
  0xcc   : > { %2325 = vmatmul.mubr.msk.f32.gmra.mrb[6].mxu1 %vm196_vm0, %v1770_v50  ;;  %v773_v29 = vadd.f32 %v725_v45, %v673_v31  ;;  %v921_v0 = vmul.f32 %v2772_v40, %v872_v5  ;;  %v547_v4 = vmul.f32 %v3456_v15, %v2737_v11  ;;  %v548_v51 = vmul.f32 %v3460_v37, %v2737_v11  ;;  %v3487_v31 = vld [vmem:[#allocation2 + $0x1f0] sm:$0xff] }
  0xcd   : > { %v1442_v33 = vadd.f32 %v1344_v19, %v1197_v30  ;;  %v747_v17 = vmul.f32 %v2768_v38, %v3215_v28  ;;  %v748_v45 = vmul.f32 %v2768_v38, %v3221_v43  ;;  %v847_v5 = vmul.f32 %v2770_v39, %v3446_v21  ;;  %4081 = vst [vmem:[#allocation21_spill] sm:$0xff] %v3476_v63  ;;  %v3480_v43 = vld [vmem:[#allocation2 + $0x190] sm:$0xff] }
  0xce   : > { %v873_v52 = vadd.f32 %v825_v42, %v773_v29  ;;  %v595_v20 = vadd.f32 %v547_v4, %v447_v3  ;;  %v596_v1 = vadd.f32 %v548_v51, %v448_v62  ;;  %v449_v54 = vmul.f32 %v3470_v16, %v2735_v10  ;;  %4082 = vst [vmem:[#allocation22_spill] sm:$0xff] %v3480_v43  ;;  %v4084_v29 = vld [vmem:[#allocation17_spill] sm:$0xff] }
  0xcf   : > { %v1687_v6 = vadd.f32 %v1589_v34, %v1442_v33  ;;  %v848_v53 = vmul.f32 %v2770_v39, %v3454_v8  ;;  %v549_v28 = vmul.f32 %v3476_v63, %v2737_v11  ;;  %v649_v42 = vmul.f32 %v3480_v43, %v2758_v32  ;;  %v4083_v34 = vld [vmem:[#allocation16_spill] sm:$0xff] }
  0xd0   : > { %v994_v3 = vmul.f32 %v2774_v41, %v873_v52  ;;  %v1239_v50 = vmul.f32 %v2785_v46, %v873_v52  ;;  %v1484_v56 = vmul.f32 %v2787_v47, %v873_v52  ;;  %v749_v30 = vmul.f32 %v2768_v38, %v3257_v13 }
  0xd1   : > { %v1755_v19 = vadd.f32 %v1723_v26, %v1687_v6  ;;  %v695_v62 = vadd.f32 %v4083_v34, %v595_v20  ;;  %v696_v4 = vadd.f32 %v4084_v29, %v596_v1  ;;  %v597_v51 = vadd.f32 %v549_v28, %v449_v54  ;;  %v2397_v1 = vld [vmem:[#allocation2 + $0x78] sm:$0xff]  ;;  %v3519_v34 = vld [vmem:[#allocation2 + $0xe0] sm:$0xff] }
  0xd2   : > { %v1100_v33 = vrot.slane %v994_v3, 2  ;;  %v1345_v8 = vrot.slane %v1239_v50, 4  ;;  %v1590_v43 = vrot.slane %v1484_v56, 6  ;;  %v1724_v21 = vmul.f32 %v2789_v48, %v873_v52  ;;  %v2398_v3 = vld [vmem:[#allocation2 + $0x80] sm:$0xff] }
  0xd3   : > { %2303 = vmatprep.mubr.msk.f32.mxu0 %vm196_vm0, %v1755_v19  ;;  %v795_v63 = vadd.f32 %v747_v17, %v695_v62  ;;  %v796_v16 = vadd.f32 %v748_v45, %v696_v4  ;;  %v697_v18 = vadd.f32 %v649_v42, %v597_v51  ;;  %v849_v7 = vmul.f32 %v2770_v39, %v3487_v31  ;;  %v3502_v42 = vld [vmem:[#allocation2 + $0xa8] sm:$0xff] }
  0xd4   : > { %v1101_v13 = vsel %vm1076_vm1, %v1098_v2, %v1100_v33  ;;  %v1346_v26 = vsel %vm1321_vm2, %v1343_v59, %v1345_v8  ;;  %v1591_v20 = vsel %vm1566_vm3, %v1588_v24, %v1590_v43  ;;  %v426_v54 = vmul.f32 %v2397_v1, %v2735_v10  ;;  %v3506_v2 = vld [vmem:[#allocation2 + $0xb0] sm:$0xff] }
  0xd5   : > { %v1198_v6 = vadd.f32 %v1101_v13, %v921_v0  ;;  %v895_v28 = vadd.f32 %v847_v5, %v795_v63  ;;  %v896_v52 = vadd.f32 %v848_v53, %v796_v16  ;;  %v427_v17 = vmul.f32 %v2398_v3, %v2735_v10 }
  0xd6   : > { %v797_v45 = vadd.f32 %v749_v30, %v697_v18  ;;  %v526_v50 = vmul.f32 %v3502_v42, %v2737_v11  ;;  %v527_v59 = vmul.f32 %v3506_v2, %v2737_v11  ;;  %v626_v24 = vmul.f32 %v2758_v32, %v3034_v57 }
  0xd7   : > { %v1443_v0 = vadd.f32 %v1346_v26, %v1198_v6  ;;  %v936_v8 = vmul.f32 %v2772_v40, %v895_v28  ;;  %v1016_v5 = vmul.f32 %v2774_v41, %v895_v28  ;;  %v1017_v18 = vmul.f32 %v2774_v41, %v896_v52 }
  0xd8   : > { %v1261_v16 = vmul.f32 %v2785_v46, %v895_v28  ;;  %v1262_v53 = vmul.f32 %v2785_v46, %v896_v52  ;;  %v1506_v63 = vmul.f32 %v2787_v47, %v895_v28  ;;  %v1507_v43 = vmul.f32 %v2787_v47, %v896_v52 }
  0xd9   : > { %v1688_v56 = vadd.f32 %v1591_v20, %v1443_v0  ;;  %v1137_v30 = vrot.slane %v1016_v5, 2  ;;  %v1138_v19 = vrot.slane %v1017_v18, 2  ;;  %v627_v57 = vmul.f32 %v3519_v34, %v2758_v32 }
  0xda   : > { %v1382_v62 = vrot.slane %v1261_v16, 4  ;;  %v1383_v29 = vrot.slane %v1262_v53, 4  ;;  %v1627_v4 = vrot.slane %v1506_v63, 6  ;;  %v1628_v51 = vrot.slane %v1507_v43, 6 }
  0xdb   : > { %v1756_v33 = vadd.f32 %v1724_v21, %v1688_v56  ;;  %v1139_v13 = vsel %vm1076_vm1, %v1137_v30, %v1138_v19  ;;  %v1739_v26 = vmul.f32 %v2789_v48, %v896_v52  ;;  %v897_v1 = vadd.f32 %v849_v7, %v797_v45 }
  0xdc   : > { %v1213_v6 = vadd.f32 %v1139_v13, %v936_v8  ;;  %v1384_v20 = vsel %vm1321_vm2, %v1382_v62, %v1383_v29  ;;  %v937_v28 = vmul.f32 %v2772_v40, %v896_v52  ;;  %v574_v3 = vadd.f32 %v526_v50, %v426_v54 }
  0xdd   : > { %2304 = vmatmul.mubr.msk.f32.gmra.mrb[8].mxu0 %vm196_vm0, %v1756_v33  ;;  %v1629_v0 = vsel %vm1566_vm3, %v1627_v4, %v1628_v51  ;;  %v1018_v5 = vmul.f32 %v2774_v41, %v897_v1  ;;  %v1263_v18 = vmul.f32 %v2785_v46, %v897_v1  ;;  %v1508_v21 = vmul.f32 %v2787_v47, %v897_v1 }
  0xde   : > { %v1458_v16 = vadd.f32 %v1384_v20, %v1213_v6  ;;  %v575_v53 = vadd.f32 %v527_v59, %v427_v17  ;;  %v674_v63 = vadd.f32 %v626_v24, %v574_v3  ;;  %v726_v7 = vmul.f32 %v2768_v38, %v4059_v55  ;;  %v3545_v20 = vld [vmem:[#allocation2 + $0xb8] sm:$0xff] }
  0xdf   : > { %v1140_v45 = vrot.slane %v1018_v5, 2  ;;  %v1385_v8 = vrot.slane %v1263_v18, 4  ;;  %v1630_v52 = vrot.slane %v1508_v21, 6  ;;  %v727_v54 = vmul.f32 %v2768_v38, %v4060_v23 }
  0xe0   : > { %v1703_v50 = vadd.f32 %v1629_v0, %v1458_v16  ;;  %v675_v43 = vadd.f32 %v627_v57, %v575_v53  ;;  %v774_v56 = vadd.f32 %v726_v7, %v674_v63  ;;  %v826_v30 = vmul.f32 %v2770_v39, %v4066_v22  ;;  %v2402_v57 = vld [vmem:[#allocation2 + $0x88] sm:$0xff] }
  0xe1   : > { %v1141_v62 = vsel %vm1076_vm1, %v1138_v19, %v1140_v45  ;;  %v1386_v17 = vsel %vm1321_vm2, %v1383_v29, %v1385_v8  ;;  %v1740_v59 = vmul.f32 %v2789_v48, %v897_v1  ;;  %v827_v55 = vmul.f32 %v2770_v39, %v4067_v61  ;;  %v3549_v19 = vld [vmem:[#allocation2 + $0xe8] sm:$0xff] }
  0xe2   : > { %v1771_v24 = vadd.f32 %v1739_v26, %v1703_v50  ;;  %v1214_v4 = vadd.f32 %v1141_v62, %v937_v28  ;;  %v775_v33 = vadd.f32 %v727_v54, %v675_v43  ;;  %v874_v13 = vadd.f32 %v826_v30, %v774_v56  ;;  %v3566_v30 = vld [vmem:[#allocation2 + $0x138] sm:$0xff] }
  0xe3   : > { %v1631_v23 = vsel %vm1566_vm3, %v1628_v51, %v1630_v52  ;;  %v428_v6 = vmul.f32 %v2402_v57, %v2735_v10  ;;  %v528_v22 = vmul.f32 %v3545_v20, %v2737_v11  ;;  %v628_v29 = vmul.f32 %v3549_v19, %v2758_v32  ;;  %v3582_v57 = vld [vmem:[#allocation2 + $0x1f8] sm:$0xff] }
  0xe4   : > { %2327 = vmatprep.mubr.msk.f32.mxu1 %vm196_vm0, %v1771_v24  ;;  %v1459_v61 = vadd.f32 %v1386_v17, %v1214_v4  ;;  %v875_v26 = vadd.f32 %v827_v55, %v775_v33  ;;  %v995_v1 = vmul.f32 %v2774_v41, %v874_v13  ;;  %v728_v51 = vmul.f32 %v2768_v38, %v4065_v36  ;;  %v3570_v17 = vld [vmem:[#allocation2 + $0x140] sm:$0xff]  ;;  %v3577_v4 = vld [vmem:[#allocation2 + $0x168] sm:$0xff] }
  0xe5   : > { %v922_v28 = vmul.f32 %v2772_v40, %v874_v13  ;;  %v1240_v3 = vmul.f32 %v2785_v46, %v874_v13  ;;  %v1485_v0 = vmul.f32 %v2787_v47, %v874_v13  ;;  %v576_v5 = vadd.f32 %v528_v22, %v428_v6  ;;  %4085 = vst [vmem:[#allocation23_spill] sm:$0xff] %v3582_v57  ;;  %v3584_v6 = vld [vmem:[#allocation2 + $0x170] sm:$0xff] }
  0xe6   : > { %v1704_v18 = vadd.f32 %v1631_v23, %v1459_v61  ;;  %v996_v21 = vmul.f32 %v2774_v41, %v875_v26  ;;  %v1102_v16 = vrot.slane %v995_v1, 2  ;;  %v1241_v53 = vmul.f32 %v2785_v46, %v875_v26 }
  0xe7   : > { %v1347_v63 = vrot.slane %v1240_v3, 4  ;;  %v1486_v7 = vmul.f32 %v2787_v47, %v875_v26  ;;  %v1592_v45 = vrot.slane %v1485_v0, 6  ;;  %v828_v36 = vmul.f32 %v2770_v39, %v3127_v44  ;;  %v3593_v3 = vld [vmem:[#allocation2 + $0x200] sm:$0xff] }
  0xe8   : > { %v1772_v8 = vadd.f32 %v1740_v59, %v1704_v18  ;;  %v1103_v52 = vrot.slane %v996_v21, 2  ;;  %v1348_v54 = vrot.slane %v1241_v53, 4  ;;  %v676_v50 = vadd.f32 %v628_v29, %v576_v5  ;;  %v3588_v29 = vld [vmem:[#allocation2 + $0x198] sm:$0xff]  ;;  %v3595_v0 = vld [vmem:[#allocation2 + $0x1a0] sm:$0xff] }
  0xe9   : > { %v1593_v43 = vrot.slane %v1486_v7, 6  ;;  %v1725_v56 = vmul.f32 %v2789_v48, %v875_v26  ;;  %v450_v62 = vmul.f32 %v3566_v30, %v2735_v10  ;;  %v451_v55 = vmul.f32 %v3570_v17, %v2735_v10 }
  0xea   : > { %2328 = vmatmul.mubr.msk.f32.gmra.mrb[8].mxu1 %vm196_vm0, %v1772_v8  ;;  %v1104_v44 = vsel %vm1076_vm1, %v1102_v16, %v1103_v52  ;;  %v1349_v59 = vsel %vm1321_vm2, %v1347_v63, %v1348_v54  ;;  %v776_v24 = vadd.f32 %v728_v51, %v676_v50  ;;  %v550_v33 = vmul.f32 %v3577_v4, %v2737_v11 }
  0xeb   : > { %v1199_v13 = vadd.f32 %v1104_v44, %v922_v28  ;;  %v923_v23 = vmul.f32 %v2772_v40, %v875_v26  ;;  %v551_v22 = vmul.f32 %v3584_v6, %v2737_v11  ;;  %v650_v61 = vmul.f32 %v3588_v29, %v2758_v32 }
  0xec   : > { %v1594_v1 = vsel %vm1566_vm3, %v1592_v45, %v1593_v43  ;;  %v876_v51 = vadd.f32 %v828_v36, %v776_v24  ;;  %v598_v28 = vadd.f32 %v550_v33, %v450_v62  ;;  %v651_v26 = vmul.f32 %v3595_v0, %v2758_v32 }
  0xed   : > { %v1444_v5 = vadd.f32 %v1349_v59, %v1199_v13  ;;  %v599_v18 = vadd.f32 %v551_v22, %v451_v55  ;;  %v750_v21 = vmul.f32 %v2768_v38, %v3324_v49  ;;  %v751_v16 = vmul.f32 %v2768_v38, %v3326_v25  ;;  %v3610_v59 = vld [vmem:[#allocation2 + $0x148] sm:$0xff] }
  0xee   : > { %v997_v53 = vmul.f32 %v2774_v41, %v876_v51  ;;  %v1242_v63 = vmul.f32 %v2785_v46, %v876_v51  ;;  %v1487_v7 = vmul.f32 %v2787_v47, %v876_v51  ;;  %v850_v45 = vmul.f32 %v2770_v39, %v3582_v57  ;;  %v3614_v22 = vld [vmem:[#allocation2 + $0x208] sm:$0xff]  ;;  %v3616_v57 = vld [vmem:[#allocation2 + $0x178] sm:$0xff] }
  0xef   : > { %v1689_v36 = vadd.f32 %v1594_v1, %v1444_v5  ;;  %v698_v8 = vadd.f32 %v650_v61, %v598_v28  ;;  %v699_v50 = vadd.f32 %v651_v26, %v599_v18  ;;  %v851_v62 = vmul.f32 %v2770_v39, %v3593_v3 }
  0xf0   : > { %v1105_v55 = vrot.slane %v997_v53, 2  ;;  %v1350_v49 = vrot.slane %v1242_v63, 4  ;;  %v1595_v44 = vrot.slane %v1487_v7, 6  ;;  %v452_v25 = vmul.f32 %v3610_v59, %v2735_v10 }
  0xf1   : > { %v1757_v24 = vadd.f32 %v1725_v56, %v1689_v36  ;;  %v798_v33 = vadd.f32 %v750_v21, %v698_v8  ;;  %v799_v13 = vadd.f32 %v751_v16, %v699_v50  ;;  %v552_v61 = vmul.f32 %v3616_v57, %v2737_v11  ;;  %v3625_v16 = vld [vmem:[#allocation2 + $0x1a8] sm:$0xff] }
  0xf2   : > { %v1106_v1 = vsel %vm1076_vm1, %v1103_v52, %v1105_v55  ;;  %v1351_v28 = vsel %vm1321_vm2, %v1348_v54, %v1350_v49  ;;  %v1596_v26 = vsel %vm1566_vm3, %v1593_v43, %v1595_v44  ;;  %v1726_v5 = vmul.f32 %v2789_v48, %v876_v51 }
  0xf3   : > { %2306 = vmatprep.mubr.msk.f32.mxu0 %vm196_vm0, %v1757_v24  ;;  %v1200_v56 = vadd.f32 %v1106_v1, %v923_v23  ;;  %v898_v18 = vadd.f32 %v850_v45, %v798_v33  ;;  %v899_v21 = vadd.f32 %v851_v62, %v799_v13  ;;  %v652_v53 = vmul.f32 %v3625_v16, %v2758_v32 }
  0xf4   : > { %v600_v63 = vadd.f32 %v552_v61, %v452_v25  ;;  %v752_v52 = vmul.f32 %v2768_v38, %v3360_v14  ;;  %v852_v54 = vmul.f32 %v2770_v39, %v3614_v22  ;;  %v529_v43 = vmul.f32 %v3379_v60, %v2737_v11 }
  0xf5   : > { %v1445_v51 = vadd.f32 %v1351_v28, %v1200_v56  ;;  %v938_v23 = vmul.f32 %v2772_v40, %v898_v18  ;;  %v1019_v7 = vmul.f32 %v2774_v41, %v898_v18  ;;  %v1020_v45 = vmul.f32 %v2774_v41, %v899_v21 }
  0xf6   : > { %v1264_v36 = vmul.f32 %v2785_v46, %v898_v18  ;;  %v1265_v8 = vmul.f32 %v2785_v46, %v899_v21  ;;  %v1509_v50 = vmul.f32 %v2787_v47, %v898_v18  ;;  %v1510_v14 = vmul.f32 %v2787_v47, %v899_v21 }
  0xf7   : > { %v1690_v62 = vadd.f32 %v1596_v26, %v1445_v51  ;;  %v1142_v55 = vrot.slane %v1019_v7, 2  ;;  %v1143_v49 = vrot.slane %v1020_v45, 2  ;;  %v530_v60 = vmul.f32 %v3383_v35, %v2737_v11  ;;  %v4086_v51 = vld [vmem:[#allocation8_spill] sm:$0xff]  ;;  %v4087_v45 = vld [vmem:[#allocation9_spill] sm:$0xff] }
  0xf8   : > { %v1387_v44 = vrot.slane %v1264_v36, 4  ;;  %v1388_v25 = vrot.slane %v1265_v8, 4  ;;  %v1632_v24 = vrot.slane %v1509_v50, 6  ;;  %v1633_v33 = vrot.slane %v1510_v14, 6 }
  0xf9   : > { %v1758_v13 = vadd.f32 %v1726_v5, %v1690_v62  ;;  %v1144_v61 = vsel %vm1076_vm1, %v1142_v55, %v1143_v49  ;;  %v1741_v1 = vmul.f32 %v2789_v48, %v899_v21  ;;  %v700_v28 = vadd.f32 %v652_v53, %v600_v63  ;;  %v4088_v55 = vld [vmem:[#allocation11_spill] sm:$0xff] }
  0xfa   : > { %v1215_v56 = vadd.f32 %v1144_v61, %v938_v23  ;;  %v1389_v18 = vsel %vm1321_vm2, %v1387_v44, %v1388_v25  ;;  %v1634_v26 = vsel %vm1566_vm3, %v1632_v24, %v1633_v33  ;;  %v577_v7 = vadd.f32 %v529_v43, %v4086_v51 }
  0xfb   : > { %2307 = vmatmul.mubr.msk.f32.gmra.mrb[10].mxu0 %vm196_vm0, %v1758_v13  ;;  %v800_v35 = vadd.f32 %v752_v52, %v700_v28  ;;  %v578_v36 = vadd.f32 %v530_v60, %v4087_v45  ;;  %v629_v5 = vmul.f32 %v3387_v12, %v2758_v32  ;;  %v630_v8 = vmul.f32 %v3391_v58, %v2758_v32  ;;  %v4089_v60 = vld [vmem:[#allocation13_spill] sm:$0xff] }
  0xfc   : > { %v1460_v50 = vadd.f32 %v1389_v18, %v1215_v56  ;;  %v729_v53 = vmul.f32 %v3400_v27, %v2768_v38  ;;  %v730_v63 = vmul.f32 %v3404_v9, %v2768_v38  ;;  %v829_v43 = vmul.f32 %v3456_v15, %v2770_v39  ;;  %v2414_v27 = vld [vmem:[#allocation2 + $0x100] sm:$0xff] }
  0xfd   : > { %v900_v23 = vadd.f32 %v852_v54, %v800_v35  ;;  %v677_v52 = vadd.f32 %v629_v5, %v577_v7  ;;  %v678_v14 = vadd.f32 %v630_v8, %v578_v36  ;;  %v830_v62 = vmul.f32 %v3460_v37, %v2770_v39  ;;  %v4090_v8 = vld [vmem:[#allocation20_spill] sm:$0xff] }
  0xfe   : > { %v1705_v12 = vadd.f32 %v1634_v26, %v1460_v50  ;;  %v431_v58 = vmul.f32 %v4088_v55, %v2735_v10  ;;  %v531_v44 = vmul.f32 %v4089_v60, %v2737_v11  ;;  %v631_v24 = vmul.f32 %v2414_v27, %v2758_v32 }
  0xff   : > { %v939_v9 = vmul.f32 %v2772_v40, %v899_v21  ;;  %v1021_v13 = vmul.f32 %v2774_v41, %v900_v23  ;;  %v1266_v54 = vmul.f32 %v2785_v46, %v900_v23  ;;  %v1511_v61 = vmul.f32 %v2787_v47, %v900_v23 }
 0x100   : > { %v1773_v28 = vadd.f32 %v1741_v1, %v1705_v12  ;;  %v777_v56 = vadd.f32 %v729_v53, %v677_v52  ;;  %v778_v18 = vadd.f32 %v730_v63, %v678_v14  ;;  %v579_v26 = vadd.f32 %v531_v44, %v431_v58  ;;  %v4091_v63 = vld [vmem:[#allocation21_spill] sm:$0xff] }
 0x101   : > { %v1145_v51 = vrot.slane %v1021_v13, 2  ;;  %v1390_v7 = vrot.slane %v1266_v54, 4  ;;  %v1635_v35 = vrot.slane %v1511_v61, 6  ;;  %v1742_v45 = vmul.f32 %v2789_v48, %v900_v23 }
 0x102   : > { %2330 = vmatprep.mubr.msk.f32.mxu1 %vm196_vm0, %v1773_v28  ;;  %v877_v36 = vadd.f32 %v829_v43, %v777_v56  ;;  %v878_v5 = vadd.f32 %v830_v62, %v778_v18  ;;  %v679_v21 = vadd.f32 %v631_v24, %v579_v26  ;;  %v731_v50 = vmul.f32 %v4090_v8, %v2768_v38  ;;  %v4092_v8 = vld [vmem:[#allocation14_spill] sm:$0xff] }
 0x103   : > { %v1146_v55 = vsel %vm1076_vm1, %v1143_v49, %v1145_v51  ;;  %v1391_v1 = vsel %vm1321_vm2, %v1388_v25, %v1390_v7  ;;  %v1636_v53 = vsel %vm1566_vm3, %v1633_v33, %v1635_v35  ;;  %v831_v52 = vmul.f32 %v4091_v63, %v2770_v39 }
 0x104   : > { %v1216_v14 = vadd.f32 %v1146_v55, %v939_v9  ;;  %v924_v23 = vmul.f32 %v2772_v40, %v877_v36  ;;  %v998_v12 = vmul.f32 %v2774_v41, %v877_v36  ;;  %v999_v43 = vmul.f32 %v2774_v41, %v878_v5 }
 0x105   : > { %v1243_v62 = vmul.f32 %v2785_v46, %v877_v36  ;;  %v1244_v58 = vmul.f32 %v2785_v46, %v878_v5  ;;  %v1488_v49 = vmul.f32 %v2787_v47, %v877_v36  ;;  %v1489_v25 = vmul.f32 %v2787_v47, %v878_v5 }
 0x106   : > { %v1461_v60 = vadd.f32 %v1391_v1, %v1216_v14  ;;  %v1107_v33 = vrot.slane %v998_v12, 2  ;;  %v1108_v44 = vrot.slane %v999_v43, 2  ;;  %v453_v27 = vmul.f32 %v3456_v15, %v2735_v10  ;;  %v2415_v1 = vld [vmem:[#allocation2 + $0x1b0] sm:$0xff]  ;;  %v4093_v43 = vld [vmem:[#allocation15_spill] sm:$0xff] }
 0x107   : > { %v1352_v24 = vrot.slane %v1243_v62, 4  ;;  %v1353_v9 = vrot.slane %v1244_v58, 4  ;;  %v1597_v13 = vrot.slane %v1488_v49, 6  ;;  %v1598_v54 = vrot.slane %v1489_v25, 6  ;;  %v400_v12 = vld [vmem:[#allocation2 + $0x210] sm:$0xff]  ;;  %v401_v25 = vld [vmem:[#allocation2 + $0x218] sm:$0xff] }
 0x108   : > { %v1706_v61 = vadd.f32 %v1636_v53, %v1461_v60  ;;  %v1109_v28 = vsel %vm1076_vm1, %v1107_v33, %v1108_v44  ;;  %v1727_v56 = vmul.f32 %v2789_v48, %v878_v5  ;;  %v779_v18 = vadd.f32 %v731_v50, %v679_v21  ;;  %v2416_v21 = vld [vmem:[#allocation2 + $0x1b8] sm:$0xff] }
 0x109   : > { %v1201_v26 = vadd.f32 %v1109_v28, %v924_v23  ;;  %v1354_v51 = vsel %vm1321_vm2, %v1352_v24, %v1353_v9  ;;  %v1599_v7 = vsel %vm1566_vm3, %v1597_v13, %v1598_v54  ;;  %v454_v35 = vmul.f32 %v3460_v37, %v2735_v10  ;;  %v4094_v23 = vld [vmem:[#allocation18_spill] sm:$0xff]  ;;  %v4095_v24 = vld [vmem:[#allocation19_spill] sm:$0xff] }
 0x10a   : > { %v1774_v36 = vadd.f32 %v1742_v45, %v1706_v61  ;;  %v879_v15 = vadd.f32 %v831_v52, %v779_v18  ;;  %v601_v55 = vadd.f32 %v4092_v8, %v453_v27  ;;  %v653_v53 = vmul.f32 %v2415_v1, %v2758_v32  ;;  %v402_v8 = vld [vmem:[#allocation2 + $0x220] sm:$0xff] }
 0x10b   : > { %v1446_v14 = vadd.f32 %v1354_v51, %v1201_v26  ;;  %v602_v62 = vadd.f32 %v4093_v43, %v454_v35  ;;  %v654_v50 = vmul.f32 %v2416_v21, %v2758_v32  ;;  %v753_v58 = vmul.f32 %v2768_v38, %v4094_v23 }
 0x10c   : > { %2331 = vmatmul.mubr.msk.f32.gmra.mrb[10].mxu1 %vm196_vm0, %v1774_v36  ;;  %v925_v37 = vmul.f32 %v2772_v40, %v878_v5  ;;  %v1000_v45 = vmul.f32 %v2774_v41, %v879_v15  ;;  %v1245_v52 = vmul.f32 %v2785_v46, %v879_v15  ;;  %v1490_v49 = vmul.f32 %v2787_v47, %v879_v15 }
 0x10d   : > { %v1691_v60 = vadd.f32 %v1599_v7, %v1446_v14  ;;  %v701_v33 = vadd.f32 %v653_v53, %v601_v55  ;;  %v702_v27 = vadd.f32 %v654_v50, %v602_v62  ;;  %v754_v13 = vmul.f32 %v2768_v38, %v4095_v24  ;;  %v2417_v50 = vld [vmem:[#allocation2 + $0x1c0] sm:$0xff] }
 0x10e   : > { %v1110_v61 = vrot.slane %v1000_v45, 2  ;;  %v1355_v28 = vrot.slane %v1245_v52, 4  ;;  %v1600_v18 = vrot.slane %v1490_v49, 6  ;;  %v853_v26 = vmul.f32 %v2770_v39, %v400_v12  ;;  %v4096_v12 = vld [vmem:[#allocation22_spill] sm:$0xff] }
 0x10f   : > { %v1759_v51 = vadd.f32 %v1727_v56, %v1691_v60  ;;  %v801_v5 = vadd.f32 %v753_v58, %v701_v33  ;;  %v802_v35 = vadd.f32 %v754_v13, %v702_v27  ;;  %v854_v36 = vmul.f32 %v2770_v39, %v401_v25 }
 0x110   : > { %v1111_v1 = vsel %vm1076_vm1, %v1108_v44, %v1110_v61  ;;  %v1356_v7 = vsel %vm1321_vm2, %v1353_v9, %v1355_v28  ;;  %v1601_v55 = vsel %vm1566_vm3, %v1598_v54, %v1600_v18  ;;  %v1728_v53 = vmul.f32 %v2789_v48, %v879_v15 }
 0x111   : > { %2309 = vmatprep.mubr.msk.f32.mxu0 %vm196_vm0, %v1759_v51  ;;  %v1202_v14 = vadd.f32 %v1111_v1, %v925_v37  ;;  %v901_v43 = vadd.f32 %v853_v26, %v801_v5  ;;  %v902_v62 = vadd.f32 %v854_v36, %v802_v35  ;;  %v455_v56 = vmul.f32 %v4091_v63, %v2735_v10  ;;  %v2418_v1 = vld [vmem:[#allocation2 + $0xd8] sm:$0xff] }
 0x112   : > { %v555_v21 = vmul.f32 %v4096_v12, %v2737_v11  ;;  %v655_v44 = vmul.f32 %v2417_v50, %v2758_v32  ;;  %v755_v9 = vmul.f32 %v2768_v38, %v3487_v31  ;;  %v855_v54 = vmul.f32 %v2770_v39, %v402_v8  ;;  %v2420_v12 = vld [vmem:[#allocation2 + $0x110] sm:$0xff] }
 0x113   : > { %v1447_v15 = vadd.f32 %v1356_v7, %v1202_v14  ;;  %v940_v23 = vmul.f32 %v2772_v40, %v901_v43  ;;  %v1022_v58 = vmul.f32 %v2774_v41, %v901_v43  ;;  %v3727_v37 = vmul.f32 %v2774_v41, %v902_v62 }
 0x114   : > { %v1267_v63 = vmul.f32 %v2785_v46, %v901_v43  ;;  %v3731_v45 = vmul.f32 %v2785_v46, %v902_v62  ;;  %v1512_v52 = vmul.f32 %v2787_v47, %v901_v43  ;;  %v3735_v49 = vmul.f32 %v2787_v47, %v902_v62 }
 0x115   : > { %v1692_v31 = vadd.f32 %v1601_v55, %v1447_v15  ;;  %v1147_v25 = vrot.slane %v1022_v58, 2  ;;  %v1148_v60 = vrot.slane %v3727_v37, 2  ;;  %v432_v33 = vmul.f32 %v3502_v42, %v2735_v10 }
 0x116   : > { %v1392_v27 = vrot.slane %v1267_v63, 4  ;;  %v1393_v24 = vrot.slane %v3731_v45, 4  ;;  %v1637_v13 = vrot.slane %v1512_v52, 6  ;;  %v1638_v61 = vrot.slane %v3735_v49, 6 }
 0x117   : > { %v1760_v28 = vadd.f32 %v1728_v53, %v1692_v31  ;;  %v1149_v18 = vsel %vm1076_vm1, %v1147_v25, %v1148_v60  ;;  %v1743_v26 = vmul.f32 %v2789_v48, %v902_v62  ;;  %v603_v51 = vadd.f32 %v555_v21, %v455_v56  ;;  %v2419_v53 = vld [vmem:[#allocation2 + $0x108] sm:$0xff] }
 0x118   : > { %v1217_v5 = vadd.f32 %v1149_v18, %v940_v23  ;;  %v1394_v35 = vsel %vm1321_vm2, %v1392_v27, %v1393_v24  ;;  %v1639_v36 = vsel %vm1566_vm3, %v1637_v13, %v1638_v61  ;;  %v433_v42 = vmul.f32 %v3506_v2, %v2735_v10 }
 0x119   : > { %2310 = vmatmul.mubr.msk.f32.gmra.mrb[12].mxu0 %vm196_vm0, %v1760_v28  ;;  %v703_v8 = vadd.f32 %v655_v44, %v603_v51  ;;  %v532_v7 = vmul.f32 %v2418_v1, %v2737_v11  ;;  %v533_v55 = vmul.f32 %v3519_v34, %v2737_v11  ;;  %v632_v14 = vmul.f32 %v2419_v53, %v2758_v32 }
 0x11a   : > { %v1462_v43 = vadd.f32 %v1394_v35, %v1217_v5  ;;  %v941_v56 = vmul.f32 %v2772_v40, %v902_v62  ;;  %v633_v21 = vmul.f32 %v2420_v12, %v2758_v32  ;;  %v732_v2 = vmul.f32 %v3566_v30, %v2768_v38  ;;  %v2421_v30 = vld [vmem:[#allocation2 + $0x118] sm:$0xff] }
 0x11b   : > { %v803_v50 = vadd.f32 %v755_v9, %v703_v8  ;;  %v580_v44 = vadd.f32 %v532_v7, %v432_v33  ;;  %v581_v15 = vadd.f32 %v533_v55, %v433_v42  ;;  %v733_v23 = vmul.f32 %v3570_v17, %v2768_v38 }
 0x11c   : > { %v1707_v58 = vadd.f32 %v1639_v36, %v1462_v43  ;;  %v832_v34 = vmul.f32 %v3577_v4, %v2770_v39  ;;  %v434_v37 = vmul.f32 %v3545_v20, %v2735_v10  ;;  %v534_v62 = vmul.f32 %v3549_v19, %v2737_v11 }
 0x11d   : > { %v903_v63 = vadd.f32 %v855_v54, %v803_v50  ;;  %v680_v45 = vadd.f32 %v632_v14, %v580_v44  ;;  %v681_v52 = vadd.f32 %v633_v21, %v581_v15  ;;  %v634_v9 = vmul.f32 %v2421_v30, %v2758_v32 }
 0x11e   : > { %v1775_v49 = vadd.f32 %v1743_v26, %v1707_v58  ;;  %v833_v17 = vmul.f32 %v3584_v6, %v2770_v39  ;;  %v582_v31 = vadd.f32 %v534_v62, %v434_v37  ;;  %v734_v25 = vmul.f32 %v3610_v59, %v2768_v38 }
 0x11f   : > { %v1024_v33 = vmul.f32 %v2774_v41, %v903_v63  ;;  %v1269_v20 = vmul.f32 %v2785_v46, %v903_v63  ;;  %v1514_v19 = vmul.f32 %v2787_v47, %v903_v63  ;;  %v834_v54 = vmul.f32 %v3616_v57, %v2770_v39 }
 0x120   : > { %2333 = vmatprep.mubr.msk.f32.mxu1 %vm196_vm0, %v1775_v49  ;;  %v1744_v27 = vmul.f32 %v2789_v48, %v903_v63  ;;  %v780_v13 = vadd.f32 %v732_v2, %v680_v45  ;;  %v781_v28 = vadd.f32 %v733_v23, %v681_v52  ;;  %v682_v18 = vadd.f32 %v634_v9, %v582_v31 }
 0x121   : > { %v1150_v26 = vrot.slane %v1024_v33, 2  ;;  %v1395_v51 = vrot.slane %v1269_v20, 4  ;;  %v1640_v5 = vrot.slane %v1514_v19, 6  ;;  %v456_v59 = vmul.f32 %v3577_v4, %v2735_v10  ;;  %v2422_v20 = vld [vmem:[#allocation2 + $0x1c8] sm:$0xff] }
 0x122   : > { %v880_v35 = vadd.f32 %v832_v34, %v780_v13  ;;  %v881_v36 = vadd.f32 %v833_v17, %v781_v28  ;;  %v782_v42 = vadd.f32 %v734_v25, %v682_v18  ;;  %v457_v8 = vmul.f32 %v3584_v6, %v2735_v10  ;;  %v403_v28 = vld [vmem:[#allocation2 + $0x228] sm:$0xff]  ;;  %v2423_v18 = vld [vmem:[#allocation2 + $0x1d0] sm:$0xff] }
 0x123   : > { %v1151_v1 = vsel %vm1076_vm1, %v1148_v60, %v1150_v26  ;;  %v1396_v7 = vsel %vm1321_vm2, %v1393_v24, %v1395_v51  ;;  %v1641_v55 = vsel %vm1566_vm3, %v1638_v61, %v1640_v5  ;;  %v556_v53 = vmul.f32 %v3588_v29, %v2737_v11  ;;  %v404_v5 = vld [vmem:[#allocation2 + $0x230] sm:$0xff] }
 0x124   : > { %v1218_v14 = vadd.f32 %v1151_v1, %v941_v56  ;;  %v926_v43 = vmul.f32 %v2772_v40, %v880_v35  ;;  %v1001_v4 = vmul.f32 %v2774_v41, %v880_v35  ;;  %v1002_v12 = vmul.f32 %v2774_v41, %v881_v36 }
 0x125   : > { %v1246_v21 = vmul.f32 %v2785_v46, %v880_v35  ;;  %v1247_v6 = vmul.f32 %v2785_v46, %v881_v36  ;;  %v1491_v60 = vmul.f32 %v2787_v47, %v880_v35  ;;  %v1492_v24 = vmul.f32 %v2787_v47, %v881_v36  ;;  %v4097_v35 = vld [vmem:[#allocation23_spill] sm:$0xff] }
 0x126   : > { %v1463_v2 = vadd.f32 %v1396_v7, %v1218_v14  ;;  %v1112_v61 = vrot.slane %v1001_v4, 2  ;;  %v1113_v50 = vrot.slane %v1002_v12, 2  ;;  %v557_v29 = vmul.f32 %v3595_v0, %v2737_v11 }
 0x127   : > { %v1357_v56 = vrot.slane %v1246_v21, 4  ;;  %v1358_v44 = vrot.slane %v1247_v6, 4  ;;  %v1602_v15 = vrot.slane %v1491_v60, 6  ;;  %v1603_v23 = vrot.slane %v1492_v24, 6 }
 0x128   : > { %v1708_v58 = vadd.f32 %v1641_v55, %v1463_v2  ;;  %v1114_v34 = vsel %vm1076_vm1, %v1112_v61, %v1113_v50  ;;  %v1729_v37 = vmul.f32 %v2789_v48, %v881_v36  ;;  %v882_v62 = vadd.f32 %v834_v54, %v782_v42 }
 0x129   : > { %v1203_v63 = vadd.f32 %v1114_v34, %v926_v43  ;;  %v1359_v45 = vsel %vm1321_vm2, %v1357_v56, %v1358_v44  ;;  %v1604_v52 = vsel %vm1566_vm3, %v1602_v15, %v1603_v23  ;;  %v604_v30 = vadd.f32 %v556_v53, %v456_v59 }
 0x12a   : > { %v1776_v9 = vadd.f32 %v1744_v27, %v1708_v58  ;;  %v1003_v0 = vmul.f32 %v2774_v41, %v882_v62  ;;  %v1248_v49 = vmul.f32 %v2785_v46, %v882_v62  ;;  %v1493_v17 = vmul.f32 %v2787_v47, %v882_v62  ;;  %v405_v58 = vld [vmem:[#allocation2 + $0x238] sm:$0xff] }
 0x12b   : > { %v1448_v31 = vadd.f32 %v1359_v45, %v1203_v63  ;;  %v927_v25 = vmul.f32 %v2772_v40, %v881_v36  ;;  %v605_v33 = vadd.f32 %v557_v29, %v457_v8  ;;  %v656_v19 = vmul.f32 %v2422_v20, %v2758_v32  ;;  %v2424_v29 = vld [vmem:[#allocation2 + $0x1d8] sm:$0xff] }
 0x12c   : > { %2334 = vmatmul.mubr.msk.f32.gmra.mrb[12].mxu1 %vm196_vm0, %v1776_v9  ;;  %v1115_v54 = vrot.slane %v1003_v0, 2  ;;  %v1360_v13 = vrot.slane %v1248_v49, 4  ;;  %v1605_v27 = vrot.slane %v1493_v17, 6  ;;  %v657_v26 = vmul.f32 %v2423_v18, %v2758_v32 }
 0x12d   : > { %v1693_v51 = vadd.f32 %v1604_v52, %v1448_v31  ;;  %v704_v59 = vadd.f32 %v656_v19, %v604_v30  ;;  %v756_v36 = vmul.f32 %v2768_v38, %v4097_v35  ;;  %v757_v42 = vmul.f32 %v2768_v38, %v3593_v3 }
 0x12e   : > { %v1116_v8 = vsel %vm1076_vm1, %v1113_v50, %v1115_v54  ;;  %v1361_v1 = vsel %vm1321_vm2, %v1358_v44, %v1360_v13  ;;  %v1606_v7 = vsel %vm1566_vm3, %v1603_v23, %v1605_v27  ;;  %v705_v55 = vadd.f32 %v657_v26, %v605_v33 }
 0x12f   : > { %v1761_v53 = vadd.f32 %v1729_v37, %v1693_v51  ;;  %v1204_v14 = vadd.f32 %v1116_v8, %v927_v25  ;;  %v804_v43 = vadd.f32 %v756_v36, %v704_v59  ;;  %v856_v4 = vmul.f32 %v2770_v39, %v403_v28 }
 0x130   : > { %v805_v12 = vadd.f32 %v757_v42, %v705_v55  ;;  %v857_v21 = vmul.f32 %v2770_v39, %v404_v5  ;;  %v458_v3 = vmul.f32 %v3616_v57, %v2735_v10  ;;  %v558_v6 = vmul.f32 %v3625_v16, %v2737_v11  ;;  %v2293_v61 = vpop.f32.mrb[0].mxu0 }
 0x131   : > { %2312 = vmatprep.mubr.msk.f32.mxu0 %vm196_vm0, %v1761_v53  ;;  %v1449_v60 = vadd.f32 %v1361_v1, %v1204_v14  ;;  %v1730_v24 = vmul.f32 %v2789_v48, %v882_v62  ;;  %v904_v2 = vadd.f32 %v856_v4, %v804_v43  ;;  %v658_v56 = vmul.f32 %v2424_v29, %v2758_v32  ;;  %v1942_v15 = vpop.f32.mrb[1].mxu0 }
 0x132   : > { %v905_v50 = vadd.f32 %v857_v21, %v805_v12  ;;  %v758_v44 = vmul.f32 %v2768_v38, %v3614_v22  ;;  %v606_v16 = vadd.f32 %v558_v6, %v458_v3  ;;  %2103 = vst.msk [vmem:[%s3829_s14 + $0x8] sm:$0xff] %vm2101_vm4, %v2293_v61  ;;  %2102 = vst.msk [vmem:[%s3829_s14] sm:$0xff] %vm2101_vm4, %v1942_v15 }
 0x133   : > { %v1694_v10 = vadd.f32 %v1606_v7, %v1449_v60  ;;  %v1025_v57 = vmul.f32 %v2774_v41, %v904_v2  ;;  %v1270_v11 = vmul.f32 %v2785_v46, %v904_v2  ;;  %v1515_v22 = vmul.f32 %v2787_v47, %v904_v2 }
 0x134   : > { %v1026_v32 = vmul.f32 %v2774_v41, %v905_v50  ;;  %v1271_v38 = vmul.f32 %v2785_v46, %v905_v50  ;;  %v1516_v23 = vmul.f32 %v2787_v47, %v905_v50  ;;  %v942_v37 = vmul.f32 %v2772_v40, %v904_v2 }
 0x135   : > { %v1762_v34 = vadd.f32 %v1730_v24, %v1694_v10  ;;  %v1152_v62 = vrot.slane %v1025_v57, 2  ;;  %v1397_v63 = vrot.slane %v1270_v11, 4  ;;  %v1642_v30 = vrot.slane %v1515_v22, 6 }
 0x136   : > { %v1153_v45 = vrot.slane %v1026_v32, 2  ;;  %v1398_v52 = vrot.slane %v1271_v38, 4  ;;  %v1643_v9 = vrot.slane %v1516_v23, 6  ;;  %v706_v0 = vadd.f32 %v658_v56, %v606_v16 }
 0x137   : > { %2313 = vmatmul.mubr.msk.f32.gmra.mrb[14].mxu0 %vm196_vm0, %v1762_v34  ;;  %v858_v49 = vmul.f32 %v2770_v39, %v405_v58  ;;  %v1745_v54 = vmul.f32 %v2789_v48, %v905_v50  ;;  %v943_v26 = vmul.f32 %v2772_v40, %v905_v50 }
 0x138   : > { %v1154_v17 = vsel %vm1076_vm1, %v1152_v62, %v1153_v45  ;;  %v1399_v31 = vsel %vm1321_vm2, %v1397_v63, %v1398_v52  ;;  %v806_v33 = vadd.f32 %v758_v44, %v706_v0  ;;  %v1644_v20 = vsel %vm1566_vm3, %v1642_v30, %v1643_v9 }
 0x139   : > { %v1219_v25 = vadd.f32 %v1154_v17, %v942_v37 }
 0x13a   : > { %v906_v13 = vadd.f32 %v858_v49, %v806_v33 }
 0x13b   : > { %v1464_v19 = vadd.f32 %v1399_v31, %v1219_v25 }
 0x13c   : > { %v1027_v28 = vmul.f32 %v2774_v41, %v906_v13  ;;  %v1272_v18 = vmul.f32 %v2785_v46, %v906_v13  ;;  %v1517_v39 = vmul.f32 %v2787_v47, %v906_v13  ;;  %v1746_v40 = vmul.f32 %v2789_v48, %v906_v13 }
 0x13d   : > { %v1709_v27 = vadd.f32 %v1644_v20, %v1464_v19 }
 0x13e   : > { %v1155_v5 = vrot.slane %v1027_v28, 2  ;;  %v1400_v59 = vrot.slane %v1272_v18, 4  ;;  %v1645_v35 = vrot.slane %v1517_v39, 6 }
 0x13f   : > { %v1777_v51 = vadd.f32 %v1745_v54, %v1709_v27 }
 0x140   : > { %v1156_v36 = vsel %vm1076_vm1, %v1153_v45, %v1155_v5  ;;  %v1401_v41 = vsel %vm1321_vm2, %v1398_v52, %v1400_v59  ;;  %v1646_v46 = vsel %vm1566_vm3, %v1643_v9, %v1645_v35 }
 0x141   : > { %2336 = vmatprep.mubr.msk.f32.mxu1 %vm196_vm0, %v1777_v51  ;;  %v1220_v42 = vadd.f32 %v1156_v36, %v943_v26 }
 0x143   : > { %v2317_v47 = vpop.f32.mrb[0].mxu1  ;;  %v1465_v8 = vadd.f32 %v1401_v41, %v1220_v42 }
 0x144   : > { %2119 = vst.msk [vmem:[%s3829_s14 + $0x88] sm:$0xff] %vm2101_vm4, %v2317_v47  ;;  %v2022_v1 = vpop.f32.mrb[1].mxu1 }
 0x145   : > { %2118 = vst.msk [vmem:[%s3829_s14 + $0x80] sm:$0xff] %vm2101_vm4, %v2022_v1  ;;  %v1710_v7 = vadd.f32 %v1646_v46, %v1465_v8 }
 0x147   : > { %v1778_v55 = vadd.f32 %v1746_v40, %v1710_v7 }
 0x149   : > { %2337 = vmatmul.mubr.msk.f32.gmra.mrb[14].mxu1 %vm196_vm0, %v1778_v55 }
 0x154   : > { %v2296_v53 = vpop.f32.mrb[2].mxu0 }
 0x155   : > { %2105 = vst.msk [vmem:[%s3829_s14 + $0x18] sm:$0xff] %vm2101_vm4, %v2296_v53  ;;  %v1952_v14 = vpop.f32.mrb[3].mxu0 }
 0x156   : > { %2104 = vst.msk [vmem:[%s3829_s14 + $0x10] sm:$0xff] %vm2101_vm4, %v1952_v14 }
 0x15f   : > { %v2320_v48 = vpop.f32.mrb[2].mxu1 }
 0x160   : > { %2121 = vst.msk [vmem:[%s3829_s14 + $0x98] sm:$0xff] %vm2101_vm4, %v2320_v48  ;;  %v2032_v43 = vpop.f32.mrb[3].mxu1 }
 0x161   : > { %2120 = vst.msk [vmem:[%s3829_s14 + $0x90] sm:$0xff] %vm2101_vm4, %v2032_v43 }
 0x172   : > { %v2299_v4 = vpop.f32.mrb[4].mxu0 }
 0x173   : > { %2107 = vst.msk [vmem:[%s3829_s14 + $0x28] sm:$0xff] %vm2101_vm4, %v2299_v4  ;;  %v1962_v12 = vpop.f32.mrb[5].mxu0 }
 0x174   : > { %2106 = vst.msk [vmem:[%s3829_s14 + $0x20] sm:$0xff] %vm2101_vm4, %v1962_v12 }
 0x181   : > { %v2323_v21 = vpop.f32.mrb[4].mxu1 }
 0x182   : > { %2123 = vst.msk [vmem:[%s3829_s14 + $0xa8] sm:$0xff] %vm2101_vm4, %v2323_v21  ;;  %v2042_v3 = vpop.f32.mrb[5].mxu1 }
 0x183   : > { %2122 = vst.msk [vmem:[%s3829_s14 + $0xa0] sm:$0xff] %vm2101_vm4, %v2042_v3 }
 0x192   : > { %v2302_v6 = vpop.f32.mrb[6].mxu0 }
 0x193   : > { %2109 = vst.msk [vmem:[%s3829_s14 + $0x38] sm:$0xff] %vm2101_vm4, %v2302_v6  ;;  %v1972_v60 = vpop.f32.mrb[7].mxu0 }
 0x194   : > { %2108 = vst.msk [vmem:[%s3829_s14 + $0x30] sm:$0xff] %vm2101_vm4, %v1972_v60 }
 0x19f   : > { %v2326_v24 = vpop.f32.mrb[6].mxu1 }
 0x1a0   : > { %2125 = vst.msk [vmem:[%s3829_s14 + $0xb8] sm:$0xff] %vm2101_vm4, %v2326_v24  ;;  %v2052_v2 = vpop.f32.mrb[7].mxu1 }
 0x1a1   : > { %2124 = vst.msk [vmem:[%s3829_s14 + $0xb0] sm:$0xff] %vm2101_vm4, %v2052_v2 }
 0x1b0   : > { %v2305_v61 = vpop.f32.mrb[8].mxu0 }
 0x1b1   : > { %2111 = vst.msk [vmem:[%s3829_s14 + $0x48] sm:$0xff] %vm2101_vm4, %v2305_v61  ;;  %v1982_v50 = vpop.f32.mrb[9].mxu0 }
 0x1b2   : > { %2110 = vst.msk [vmem:[%s3829_s14 + $0x40] sm:$0xff] %vm2101_vm4, %v1982_v50 }
 0x1bd   : > { %v2329_v29 = vpop.f32.mrb[8].mxu1 }
 0x1be   : > { %2127 = vst.msk [vmem:[%s3829_s14 + $0xc8] sm:$0xff] %vm2101_vm4, %v2329_v29  ;;  %v2062_v56 = vpop.f32.mrb[9].mxu1 }
 0x1bf   : > { %2126 = vst.msk [vmem:[%s3829_s14 + $0xc0] sm:$0xff] %vm2101_vm4, %v2062_v56 }
 0x1ce   : > { %v2308_v44 = vpop.f32.mrb[10].mxu0 }
 0x1cf   : > { %2113 = vst.msk [vmem:[%s3829_s14 + $0x58] sm:$0xff] %vm2101_vm4, %v2308_v44  ;;  %v1992_v15 = vpop.f32.mrb[11].mxu0 }
 0x1d0   : > { %2112 = vst.msk [vmem:[%s3829_s14 + $0x50] sm:$0xff] %vm2101_vm4, %v1992_v15 }
 0x1df   : > { %v2332_v10 = vpop.f32.mrb[10].mxu1 }
 0x1e0   : > { %2129 = vst.msk [vmem:[%s3829_s14 + $0xd8] sm:$0xff] %vm2101_vm4, %v2332_v10  ;;  %v2072_v57 = vpop.f32.mrb[11].mxu1 }
 0x1e1   : > { %2128 = vst.msk [vmem:[%s3829_s14 + $0xd0] sm:$0xff] %vm2101_vm4, %v2072_v57 }
 0x1ec   : > { %v2311_v11 = vpop.f32.mrb[12].mxu0 }
 0x1ed   : > { %2115 = vst.msk [vmem:[%s3829_s14 + $0x68] sm:$0xff] %vm2101_vm4, %v2311_v11  ;;  %v2002_v16 = vpop.f32.mrb[13].mxu0 }
 0x1ee   : > { %2114 = vst.msk [vmem:[%s3829_s14 + $0x60] sm:$0xff] %vm2101_vm4, %v2002_v16 }
 0x1ff   : > { %v2335_v32 = vpop.f32.mrb[12].mxu1 }
 0x200   : > { %2131 = vst.msk [vmem:[%s3829_s14 + $0xe8] sm:$0xff] %vm2101_vm4, %v2335_v32  ;;  %v2082_v38 = vpop.f32.mrb[13].mxu1 }
 0x201   : > { %2130 = vst.msk [vmem:[%s3829_s14 + $0xe0] sm:$0xff] %vm2101_vm4, %v2082_v38 }
 0x20a   : > { %v2314_v22 = vpop.f32.mrb[14].mxu0 }
 0x20b   : > { %2117 = vst.msk [vmem:[%s3829_s14 + $0x78] sm:$0xff] %vm2101_vm4, %v2314_v22  ;;  %v2012_v23 = vpop.f32.mrb[15].mxu0 }
 0x20c   : > { %2116 = vst.msk [vmem:[%s3829_s14 + $0x70] sm:$0xff] %vm2101_vm4, %v2012_v23 }
 0x21c   : > { %v2338_v58 = vpop.f32.mrb[14].mxu1 }
 0x21d   : > { %2133 = vst.msk [vmem:[%s3829_s14 + $0xf8] sm:$0xff] %vm2101_vm4, %v2338_v58  ;;  %v2092_v34 = vpop.f32.mrb[15].mxu1 }
 0x21e   : > { %2132 = vst.msk [vmem:[%s3829_s14 + $0xf0] sm:$0xff] %vm2101_vm4, %v2092_v34 }
 0x21f   : > { %2438 = shalt.err (!%p2435_p3)
}
 0x220   : > { %s2439_s7 = scalar_lea.hbm %s3917_s28, 4096  ;;  %s2443_s10 = scalar_lea.hbm %s3972_s4, 8192 }
 0x221   : > { %p2440_p4 = scmp.ne.s32.totalorder %s3917_s28, %s2439_s7  ;;  %p2444_p9 = scmp.lt.u32.totalorder %s3917_s28, %s3972_s4 }
 0x222   : > { %p2445_p10 = scmp.lt.u32.totalorder %s2443_s10, %s2439_s7  ;;  %p2447_p12 = scmp.lt.u32.totalorder %s2439_s7, %s3917_s28 }
 0x223   : > { %p2441_p7 = pnand %p2440_p4, %p2556_p5 }
 0x224   : > { %p2446_p11 = por %p2445_p10, %p2444_p9 }
 0x225   : > { %p2442_p8 = pneg %p2441_p7 }
 0x226   : > { %p2448_p13 = por %p2447_p12, %p2446_p11 }
 0x228   : > { %p2449_p0 = pnand %p2448_p13, %p2442_p8 }
 0x22a   : > { %2452 = shalt.err (!%p2449_p0)
}
 0x22b   : > { %s2491_s13 = smov 128   ;;  %s2492_s14 = smov 8  }
 0x22c   : > { %2341 = dma.vmem_to_hbm [thread:$0]  (%p2556_p5), %s3919_s22, 4096, %s3917_s28, %s3927_s29, %s2491_s13, %s2491_s13, %s2492_s14  }
 0x22d PF: > { %p2347_p1 = scmp.ge.s32.totalorder %s2487_s18, 2  ;;  %s2163_s20 = sand.u32 1, %s2475_s15  }
 0x22e   : > { %s2164_s23 = scalar_lea.sflag [#allocation4], %s2163_s20 }
 0x22f   : > { %p2344_p2 = pnand %p2347_p1, %p2560_p6 }
 0x231   : > { %2470 = dma.done.wait (!%p2344_p2), %s2164_s23, 4096  }
 0x232   : > { %2472 = vsyncadd (!%p2344_p2), %s2164_s23, 4294963200  ;;  %p14_p3 = scmp.ge.s32.totalorder %s2543_s21, 4   ;;  %s4098_s15 = smov %s2479_s16 }
 0x233   : > { %s4099_s16 = smov %s2483_s17  ;;  %s4100_s17 = smov %s2554_s24 }
 0x234   : > { %s4101_s18 = smov %s2543_s21  ;;  %16 = sbr.rel (!%p14_p3) target bundleno = 3 (0x3), region = 72 }
 0x23b   :  { %2169 = vsyncpa [#allocation4], 1 }
 0x23c   :  { %2171 = vsyncpa [#allocation4 + $0x1], 1 }

</bundles_post_ra>
